<compile_context>
chip_gen: v7x
topology: tpu7x:2x2x1
jax: 0.10.0
libtpu: 0.0.40
codegen_flags: <defaults>
</compile_context>

<pallas_src>
import jax
import jax.numpy as jnp
from jax import lax
from jax.experimental import pallas as pl
from jax.experimental.pallas import tpu as pltpu

# Problem sizes (consistent with the module: seq=8, batch=2, hidden=32, 4 heads).
S, B, E, H = 8, 2, 32, 4
DH = E // H
N = S * B                      # tokens, row r <-> (s = r // B, b = r % B)
EPS = 1e-5
PAD = 8                        # sublane-aligned zero-pad rows in the conv scratch
NEG = -1e30                    # effectively -inf for masking / maxpool padding


# ----------------------------------------------------------------------------
# The single fused kernel.
# ----------------------------------------------------------------------------
def _encoder_layer_kernel(x_ref, wqkv_ref, bqkv_ref, wo_ref, bo_ref,
                          g1_ref, beta1_ref,
                          wtap_ref, wpool_ref, bcat_ref, wc_ref, bcc_ref,
                          wlin_ref, blin_ref, g2_ref, beta2_ref,
                          out_ref, pad_ref):
    x = x_ref[...]                                   # (N, E) f32, seq-major tokens
    xb = x.astype(jnp.bfloat16)

    # ---- multi-head self-attention (fused QKV, q-scale folded into weights) ----
    qkv = jnp.dot(xb, wqkv_ref[...],
                  preferred_element_type=jnp.float32) + bqkv_ref[...]   # (N, 3E)
    qb = qkv[:, 0 * E:1 * E].astype(jnp.bfloat16)
    kb = qkv[:, 1 * E:2 * E].astype(jnp.bfloat16)
    vb = qkv[:, 2 * E:3 * E].astype(jnp.bfloat16)

    # Tokens i, j may attend only if they belong to the same batch element.
    ri = lax.broadcasted_iota(jnp.int32, (N, N), 0)
    ci = lax.broadcasted_iota(jnp.int32, (N, N), 1)
    attn_bias = jnp.where((ri % B) == (ci % B), 0.0, NEG)               # (N, N)

    attn = jnp.zeros((N, E), jnp.float32)
    for h in range(H):                                # unrolled, H = 4
        sl = slice(h * DH, (h + 1) * DH)
        s = jnp.einsum("id,jd->ij", qb[:, sl], kb[:, sl],
                       preferred_element_type=jnp.float32) + attn_bias  # (N, N)
        m = jnp.max(s, axis=-1, keepdims=True)
        p = jnp.exp(s - m)
        l = jnp.sum(p, axis=-1, keepdims=True)
        oh = jnp.dot(p.astype(jnp.bfloat16), vb[:, sl],
                     preferred_element_type=jnp.float32)                # (N, DH)
        oh = oh * pl.reciprocal(l, approx=True)       # deferred softmax normalize
        # out-projection accumulated per head: no concatenation of heads.
        attn = attn + jnp.dot(oh.astype(jnp.bfloat16), wo_ref[h],
                              preferred_element_type=jnp.float32)
    attn = attn + bo_ref[...]

    # ---- residual + LayerNorm 1 (f32 statistics) ----
    z = x + attn
    mu = jnp.mean(z, axis=-1, keepdims=True)
    zc = z - mu
    var = jnp.mean(zc * zc, axis=-1, keepdims=True)
    n1 = zc * lax.rsqrt(var + EPS) * g1_ref[...] + beta1_ref[...]       # (N, E)

    # ---- Inception block + OneDCNNNorm as shifted-row matmuls ----
    # Zero-padded copy of n1 in VMEM scratch; a seq shift of o within each
    # batch element is a global row shift of o*B (rows that fall outside the
    # sequence read zeros from the padding).
    pad_ref[...] = jnp.zeros((N + 2 * PAD, E), jnp.float32)
    pad_ref[PAD:PAD + N, :] = n1
    padv = pad_ref[...]
    shifted = [padv[PAD + o * B:PAD + o * B + N, :] for o in (-2, -1, 0, 1, 2)]

    # conv1 / conv3 / conv5 branches: accumulate directly into the lane-dense
    # (N, 4E) = (16, 128) "cat" tile via pre-padded per-offset weights.
    acc = jnp.zeros((N, 4 * E), jnp.float32)
    for i in range(5):
        acc = acc + jnp.dot(shifted[i].astype(jnp.bfloat16), wtap_ref[i],
                            preferred_element_type=jnp.float32)

    # max_pool1d(kernel=3, stride=1, padding=1) branch (padding value = -inf).
    row = lax.broadcasted_iota(jnp.int32, (N, E), 0)
    left = jnp.where(row >= B, shifted[1], NEG)
    right = jnp.where(row < N - B, shifted[3], NEG)
    pooled = jnp.maximum(shifted[2], jnp.maximum(left, right))
    acc = acc + jnp.dot(pooled.astype(jnp.bfloat16), wpool_ref[...],
                        preferred_element_type=jnp.float32)

    cat = jnp.maximum(acc + bcat_ref[...], 0.0)                         # (N, 4E)
    # OneDCNNNorm: dropout (identity) -> 1x1 conv (K=128 matmul) -> ReLU.
    cnn = jnp.maximum(
        jnp.dot(cat.astype(jnp.bfloat16), wc_ref[...],
                preferred_element_type=jnp.float32) + bcc_ref[...], 0.0)

    # ---- Linear + residual + LayerNorm 2 ----
    lin = jnp.dot(cnn.astype(jnp.bfloat16), wlin_ref[...],
                  preferred_element_type=jnp.float32) + blin_ref[...]
    z2 = n1 + lin
    mu2 = jnp.mean(z2, axis=-1, keepdims=True)
    zc2 = z2 - mu2
    var2 = jnp.mean(zc2 * zc2, axis=-1, keepdims=True)
    out_ref[...] = zc2 * lax.rsqrt(var2 + EPS) * g2_ref[...] + beta2_ref[...]


def _encoder_layer_call(x2d, f):
    return pl.pallas_call(
        _encoder_layer_kernel,
        out_shape=jax.ShapeDtypeStruct((N, E), jnp.float32),
        scratch_shapes=[pltpu.VMEM((N + 2 * PAD, E), jnp.float32)],
    )(x2d, f["wqkv"], f["bqkv"], f["wo"], f["bo"], f["g1"], f["beta1"],
      f["wtap"], f["wpool"], f["bcat"], f["wc"], f["bcc"],
      f["wlin"], f["blin"], f["g2"], f["beta2"])


@jax.jit
def transformer_encoder_layer(src_sbe, fused):
    # (S, B, E) -> (S*B, E) is a free, contiguity-preserving reshape (no
    # transpose, no data movement); row r is token (s = r // B, b = r % B).
    x2d = src_sbe.reshape(N, E)
    out2d = _encoder_layer_call(x2d, fused)
    return out2d.reshape(S, B, E)


# ----------------------------------------------------------------------------
# Deterministic synthetic parameters in PyTorch layout, then pre-fused for the
# kernel (QKV fusion + q-scale folding, per-offset inception weights, etc.).
# ----------------------------------------------------------------------------
def init_params(key):
    ks = iter(jax.random.split(key, 24))
    sc = 0.05

    def w(shape):
        return jax.random.normal(next(ks), shape, jnp.float32) * sc

    return {
        # nn.MultiheadAttention (in_proj split into q/k/v + out_proj)
        "w_q": w((E, E)), "w_k": w((E, E)), "w_v": w((E, E)),
        "b_q": w((E,)), "b_k": w((E,)), "b_v": w((E,)),
        "w_o": w((E, E)), "b_o": w((E,)),
        # norm1 / norm2 (default init)
        "g1": jnp.ones((E,), jnp.float32), "beta1": jnp.zeros((E,), jnp.float32),
        "g2": jnp.ones((E,), jnp.float32), "beta2": jnp.zeros((E,), jnp.float32),
        # InceptionBlock Conv1d weights, PyTorch (out, in, k) layout
        "conv1_w": w((E, E, 1)), "conv1_b": w((E,)),
        "conv3_w": w((E, E, 3)), "conv3_b": w((E,)),
        "conv5_w": w((E, E, 5)), "conv5_b": w((E,)),
        "pool_w": w((E, E, 1)), "pool_b": w((E,)),
        # OneDCNNNorm 1x1 conv (4E -> E)
        "cnorm_w": w((E, 4 * E, 1)), "cnorm_b": w((E,)),
        # Linear
        "lin_w": w((E, E)), "lin_b": w((E,)),
    }


def fuse_params(p):
    """Pre-fuse / pre-transpose PyTorch-layout params for the fused kernel."""
    bf = lambda a: a.astype(jnp.bfloat16)
    scale = 1.0 / (DH ** 0.5)

    # QKV projection: q = (x @ W_q.T + b_q) * scale, scale folded into weights.
    wqkv = jnp.concatenate(
        [(p["w_q"] * scale).T, p["w_k"].T, p["w_v"].T], axis=1)          # (E, 3E)
    bqkv = jnp.concatenate([p["b_q"] * scale, p["b_k"], p["b_v"]])[None, :]
    wo = p["w_o"].T.reshape(H, DH, E)       # per-head slices of the out-proj
    bo = p["b_o"][None, :]

    # Inception branches as per-seq-offset (E, 4E) weights; lane layout of the
    # "cat" tile is [conv1 | conv3 | conv5 | pool], matching torch.cat order.
    def tap(conv_w, t):                     # Conv1d weight (out, in, k) -> (in, out)
        return conv_w[:, :, t].T

    zero = jnp.zeros((E, E), jnp.float32)

    def offset_weight(o):
        b1 = tap(p["conv1_w"], 0) if o == 0 else zero
        b3 = tap(p["conv3_w"], o + 1) if -1 <= o <= 1 else zero
        b5 = tap(p["conv5_w"], o + 2)
        return jnp.concatenate([b1, b3, b5, zero], axis=1)               # (E, 4E)

    wtap = jnp.stack([offset_weight(o) for o in (-2, -1, 0, 1, 2)])      # (5, E, 4E)
    wpool = jnp.concatenate([zero, zero, zero, tap(p["pool_w"], 0)], axis=1)
    bcat = jnp.concatenate(
        [p["conv1_b"], p["conv3_b"], p["conv5_b"], p["pool_b"]])[None, :]

    return {
        "wqkv": bf(wqkv), "bqkv": bqkv, "wo": bf(wo), "bo": bo,
        "g1": p["g1"][None, :], "beta1": p["beta1"][None, :],
        "wtap": bf(wtap), "wpool": bf(wpool), "bcat": bcat,
        "wc": bf(p["cnorm_w"][:, :, 0].T), "bcc": p["cnorm_b"][None, :],
        "wlin": bf(p["lin_w"].T), "blin": p["lin_b"][None, :],
        "g2": p["g2"][None, :], "beta2": p["beta2"][None, :],
    }


if __name__ == "__main__":
    key = jax.random.PRNGKey(0)
    k_src, k_par = jax.random.split(key)
    src = jax.random.normal(k_src, (S, B, E), jnp.float32)   # (seq, batch, embed)
    params = init_params(k_par)
    fused = fuse_params(params)

    out = transformer_encoder_layer(src, fused)
    out = jax.block_until_ready(out)
    assert out.shape == (S, B, E), out.shape
    assert jnp.all(jnp.isfinite(out))
    print("KERNEL_OK")
</pallas_src>

<mosaic_0001>
module attributes {stable_mosaic.version = 11 : i64} {
  func.func @_encoder_layer_kernel(%arg0: memref<16x32xf32, #tpu.memory_space<vmem>>, %arg1: memref<32x96xbf16, #tpu.memory_space<vmem>>, %arg2: memref<1x96xf32, #tpu.memory_space<vmem>>, %arg3: memref<4x8x32xbf16, #tpu.memory_space<vmem>>, %arg4: memref<1x32xf32, #tpu.memory_space<vmem>>, %arg5: memref<1x32xf32, #tpu.memory_space<vmem>>, %arg6: memref<1x32xf32, #tpu.memory_space<vmem>>, %arg7: memref<5x32x128xbf16, #tpu.memory_space<vmem>>, %arg8: memref<32x128xbf16, #tpu.memory_space<vmem>>, %arg9: memref<1x128xf32, #tpu.memory_space<vmem>>, %arg10: memref<128x32xbf16, #tpu.memory_space<vmem>>, %arg11: memref<1x32xf32, #tpu.memory_space<vmem>>, %arg12: memref<32x32xbf16, #tpu.memory_space<vmem>>, %arg13: memref<1x32xf32, #tpu.memory_space<vmem>>, %arg14: memref<1x32xf32, #tpu.memory_space<vmem>>, %arg15: memref<1x32xf32, #tpu.memory_space<vmem>>, %arg16: memref<16x32xf32, #tpu.memory_space<vmem>>, %arg17: memref<32x32xf32, #tpu.memory_space<vmem>>) attributes {dimension_semantics = [], scalar_prefetch = 0 : i64, scratch_operands = 1 : i64, tpu.core_type = #tpu.core_type<tc>} {
    %c0 = arith.constant 0 : index
    %c0_0 = arith.constant 0 : index
    %0 = vector.load %arg0[%c0, %c0_0] : memref<16x32xf32, #tpu.memory_space<vmem>>, vector<16x32xf32>
    %1 = arith.truncf %0 : vector<16x32xf32> to vector<16x32xbf16>
    %c0_1 = arith.constant 0 : index
    %c0_2 = arith.constant 0 : index
    %2 = vector.load %arg1[%c0_1, %c0_2] : memref<32x96xbf16, #tpu.memory_space<vmem>>, vector<32x96xbf16>
    %cst = arith.constant dense<0.000000e+00> : vector<16x96xf32>
    %3 = tpu.matmul %1, %2, %cst {dimension_numbers = #tpu.dot_dimension_numbers<[1], [0], [0], [1], [0, 0, 1, 1], [], []>} : vector<16x32xbf16>, vector<32x96xbf16>, vector<16x96xf32> -> vector<16x96xf32>
    %c0_3 = arith.constant 0 : index
    %c0_4 = arith.constant 0 : index
    %4 = vector.load %arg2[%c0_3, %c0_4] : memref<1x96xf32, #tpu.memory_space<vmem>>, vector<1x96xf32>
    %5 = vector.broadcast %4 : vector<1x96xf32> to vector<16x96xf32>
    %6 = arith.addf %3, %5 : vector<16x96xf32>
    %7 = vector.extract_strided_slice %6 {offsets = [0, 0], sizes = [16, 32], strides = [1, 1]} : vector<16x96xf32> to vector<16x32xf32>
    %8 = arith.truncf %7 : vector<16x32xf32> to vector<16x32xbf16>
    %9 = vector.extract_strided_slice %6 {offsets = [0, 32], sizes = [16, 32], strides = [1, 1]} : vector<16x96xf32> to vector<16x32xf32>
    %10 = arith.truncf %9 : vector<16x32xf32> to vector<16x32xbf16>
    %11 = vector.extract_strided_slice %6 {offsets = [0, 64], sizes = [16, 32], strides = [1, 1]} : vector<16x96xf32> to vector<16x32xf32>
    %12 = arith.truncf %11 : vector<16x32xf32> to vector<16x32xbf16>
    %13 = tpu.iota {dimensions = array<i32: 0>} : vector<16x16xi32>
    %14 = tpu.iota {dimensions = array<i32: 1>} : vector<16x16xi32>
    %c2_i32 = arith.constant 2 : i32
    %c0_i32 = arith.constant 0 : i32
    %15 = arith.cmpi eq, %c2_i32, %c0_i32 : i32
    %c1_i32 = arith.constant 1 : i32
    %16 = arith.select %15, %c1_i32, %c2_i32 : i32
    %17 = vector.broadcast %16 : i32 to vector<16x16xi32>
    %18 = arith.remsi %13, %17 : vector<16x16xi32>
    %c0_i32_5 = arith.constant 0 : i32
    %19 = vector.broadcast %c0_i32_5 : i32 to vector<16x16xi32>
    %20 = arith.cmpi ne, %18, %19 : vector<16x16xi32>
    %c0_i32_6 = arith.constant 0 : i32
    %21 = vector.broadcast %c0_i32_6 : i32 to vector<16x16xi32>
    %22 = arith.cmpi slt, %18, %21 : vector<16x16xi32>
    %c0_i32_7 = arith.constant 0 : i32
    %23 = arith.cmpi slt, %16, %c0_i32_7 : i32
    %24 = vector.broadcast %23 : i1 to vector<16x16xi1>
    %25 = vector.broadcast %24 : vector<16x16xi1> to vector<16x16xi1>
    %26 = arith.xori %22, %25 : vector<16x16xi1>
    %27 = arith.andi %26, %20 : vector<16x16xi1>
    %28 = vector.broadcast %16 : i32 to vector<16x16xi32>
    %29 = arith.addi %18, %28 : vector<16x16xi32>
    %30 = arith.select %27, %29, %18 : vector<16x16xi1>, vector<16x16xi32>
    %c2_i32_8 = arith.constant 2 : i32
    %c0_i32_9 = arith.constant 0 : i32
    %31 = arith.cmpi eq, %c2_i32_8, %c0_i32_9 : i32
    %c1_i32_10 = arith.constant 1 : i32
    %32 = arith.select %31, %c1_i32_10, %c2_i32_8 : i32
    %33 = vector.broadcast %32 : i32 to vector<16x16xi32>
    %34 = arith.remsi %14, %33 : vector<16x16xi32>
    %c0_i32_11 = arith.constant 0 : i32
    %35 = vector.broadcast %c0_i32_11 : i32 to vector<16x16xi32>
    %36 = arith.cmpi ne, %34, %35 : vector<16x16xi32>
    %c0_i32_12 = arith.constant 0 : i32
    %37 = vector.broadcast %c0_i32_12 : i32 to vector<16x16xi32>
    %38 = arith.cmpi slt, %34, %37 : vector<16x16xi32>
    %c0_i32_13 = arith.constant 0 : i32
    %39 = arith.cmpi slt, %32, %c0_i32_13 : i32
    %40 = vector.broadcast %39 : i1 to vector<16x16xi1>
    %41 = vector.broadcast %40 : vector<16x16xi1> to vector<16x16xi1>
    %42 = arith.xori %38, %41 : vector<16x16xi1>
    %43 = arith.andi %42, %36 : vector<16x16xi1>
    %44 = vector.broadcast %32 : i32 to vector<16x16xi32>
    %45 = arith.addi %34, %44 : vector<16x16xi32>
    %46 = arith.select %43, %45, %34 : vector<16x16xi1>, vector<16x16xi32>
    %47 = arith.cmpi eq, %30, %46 : vector<16x16xi32>
    %cst_14 = arith.constant 0.000000e+00 : f32
    %cst_15 = arith.constant -1.000000e+30 : f32
    %48 = vector.broadcast %cst_14 : f32 to vector<16x16xf32>
    %49 = vector.broadcast %cst_15 : f32 to vector<16x16xf32>
    %50 = arith.select %47, %48, %49 : vector<16x16xi1>, vector<16x16xf32>
    %cst_16 = arith.constant 0.000000e+00 : f32
    %51 = vector.broadcast %cst_16 : f32 to vector<16x32xf32>
    %52 = vector.extract_strided_slice %8 {offsets = [0, 0], sizes = [16, 8], strides = [1, 1]} : vector<16x32xbf16> to vector<16x8xbf16>
    %53 = vector.extract_strided_slice %10 {offsets = [0, 0], sizes = [16, 8], strides = [1, 1]} : vector<16x32xbf16> to vector<16x8xbf16>
    "tpu.trace_start"() <{level = 10 : i32, message = "id,jd->ij"}> : () -> ()
    %cst_17 = arith.constant dense<0.000000e+00> : vector<16x16xf32>
    %54 = tpu.matmul %52, %53, %cst_17 {dimension_numbers = #tpu.dot_dimension_numbers<[1], [1], [0], [0], [0, 0, 1, 0], [], []>} : vector<16x8xbf16>, vector<16x8xbf16>, vector<16x16xf32> -> vector<16x16xf32>
    "tpu.trace_stop"() : () -> ()
    %55 = arith.addf %54, %50 : vector<16x16xf32>
    %cst_18 = arith.constant dense<0xFF800000> : vector<16xf32>
    %56 = vector.multi_reduction <maximumf>, %55, %cst_18 [1] : vector<16x16xf32> to vector<16xf32>
    %57 = vector.shape_cast %56 : vector<16xf32> to vector<16x1xf32>
    %58 = vector.broadcast %57 : vector<16x1xf32> to vector<16x16xf32>
    %59 = arith.subf %55, %58 : vector<16x16xf32>
    %60 = math.exp %59 : vector<16x16xf32>
    %cst_19 = arith.constant dense<0.000000e+00> : vector<16xf32>
    %61 = vector.multi_reduction <add>, %60, %cst_19 [1] : vector<16x16xf32> to vector<16xf32>
    %62 = vector.shape_cast %61 : vector<16xf32> to vector<16x1xf32>
    %63 = arith.truncf %60 : vector<16x16xf32> to vector<16x16xbf16>
    %64 = vector.extract_strided_slice %12 {offsets = [0, 0], sizes = [16, 8], strides = [1, 1]} : vector<16x32xbf16> to vector<16x8xbf16>
    %cst_20 = arith.constant dense<0.000000e+00> : vector<16x8xf32>
    %65 = tpu.matmul %63, %64, %cst_20 {dimension_numbers = #tpu.dot_dimension_numbers<[1], [0], [0], [1], [0, 0, 1, 1], [], []>} : vector<16x16xbf16>, vector<16x8xbf16>, vector<16x8xf32> -> vector<16x8xf32>
    %66 = tpu.reciprocal %62 {approx = true} : vector<16x1xf32> -> vector<16x1xf32>
    %67 = vector.broadcast %66 : vector<16x1xf32> to vector<16x8xf32>
    %68 = arith.mulf %65, %67 : vector<16x8xf32>
    %69 = arith.truncf %68 : vector<16x8xf32> to vector<16x8xbf16>
    %c0_21 = arith.constant 0 : index
    %c0_22 = arith.constant 0 : index
    %c0_23 = arith.constant 0 : index
    %70 = vector.load %arg3[%c0_21, %c0_22, %c0_23] : memref<4x8x32xbf16, #tpu.memory_space<vmem>>, vector<1x8x32xbf16>
    %71 = vector.shape_cast %70 : vector<1x8x32xbf16> to vector<8x32xbf16>
    %cst_24 = arith.constant dense<0.000000e+00> : vector<16x32xf32>
    %72 = tpu.matmul %69, %71, %cst_24 {dimension_numbers = #tpu.dot_dimension_numbers<[1], [0], [0], [1], [0, 0, 1, 1], [], []>} : vector<16x8xbf16>, vector<8x32xbf16>, vector<16x32xf32> -> vector<16x32xf32>
    %73 = arith.addf %51, %72 : vector<16x32xf32>
    %74 = vector.extract_strided_slice %8 {offsets = [0, 8], sizes = [16, 8], strides = [1, 1]} : vector<16x32xbf16> to vector<16x8xbf16>
    %75 = vector.extract_strided_slice %10 {offsets = [0, 8], sizes = [16, 8], strides = [1, 1]} : vector<16x32xbf16> to vector<16x8xbf16>
    "tpu.trace_start"() <{level = 10 : i32, message = "id,jd->ij"}> : () -> ()
    %cst_25 = arith.constant dense<0.000000e+00> : vector<16x16xf32>
    %76 = tpu.matmul %74, %75, %cst_25 {dimension_numbers = #tpu.dot_dimension_numbers<[1], [1], [0], [0], [0, 0, 1, 0], [], []>} : vector<16x8xbf16>, vector<16x8xbf16>, vector<16x16xf32> -> vector<16x16xf32>
    "tpu.trace_stop"() : () -> ()
    %77 = arith.addf %76, %50 : vector<16x16xf32>
    %cst_26 = arith.constant dense<0xFF800000> : vector<16xf32>
    %78 = vector.multi_reduction <maximumf>, %77, %cst_26 [1] : vector<16x16xf32> to vector<16xf32>
    %79 = vector.shape_cast %78 : vector<16xf32> to vector<16x1xf32>
    %80 = vector.broadcast %79 : vector<16x1xf32> to vector<16x16xf32>
    %81 = arith.subf %77, %80 : vector<16x16xf32>
    %82 = math.exp %81 : vector<16x16xf32>
    %cst_27 = arith.constant dense<0.000000e+00> : vector<16xf32>
    %83 = vector.multi_reduction <add>, %82, %cst_27 [1] : vector<16x16xf32> to vector<16xf32>
    %84 = vector.shape_cast %83 : vector<16xf32> to vector<16x1xf32>
    %85 = arith.truncf %82 : vector<16x16xf32> to vector<16x16xbf16>
    %86 = vector.extract_strided_slice %12 {offsets = [0, 8], sizes = [16, 8], strides = [1, 1]} : vector<16x32xbf16> to vector<16x8xbf16>
    %cst_28 = arith.constant dense<0.000000e+00> : vector<16x8xf32>
    %87 = tpu.matmul %85, %86, %cst_28 {dimension_numbers = #tpu.dot_dimension_numbers<[1], [0], [0], [1], [0, 0, 1, 1], [], []>} : vector<16x16xbf16>, vector<16x8xbf16>, vector<16x8xf32> -> vector<16x8xf32>
    %88 = tpu.reciprocal %84 {approx = true} : vector<16x1xf32> -> vector<16x1xf32>
    %89 = vector.broadcast %88 : vector<16x1xf32> to vector<16x8xf32>
    %90 = arith.mulf %87, %89 : vector<16x8xf32>
    %91 = arith.truncf %90 : vector<16x8xf32> to vector<16x8xbf16>
    %c1 = arith.constant 1 : index
    %c0_29 = arith.constant 0 : index
    %c0_30 = arith.constant 0 : index
    %92 = vector.load %arg3[%c1, %c0_29, %c0_30] : memref<4x8x32xbf16, #tpu.memory_space<vmem>>, vector<1x8x32xbf16>
    %93 = vector.shape_cast %92 : vector<1x8x32xbf16> to vector<8x32xbf16>
    %cst_31 = arith.constant dense<0.000000e+00> : vector<16x32xf32>
    %94 = tpu.matmul %91, %93, %cst_31 {dimension_numbers = #tpu.dot_dimension_numbers<[1], [0], [0], [1], [0, 0, 1, 1], [], []>} : vector<16x8xbf16>, vector<8x32xbf16>, vector<16x32xf32> -> vector<16x32xf32>
    %95 = arith.addf %73, %94 : vector<16x32xf32>
    %96 = vector.extract_strided_slice %8 {offsets = [0, 16], sizes = [16, 8], strides = [1, 1]} : vector<16x32xbf16> to vector<16x8xbf16>
    %97 = vector.extract_strided_slice %10 {offsets = [0, 16], sizes = [16, 8], strides = [1, 1]} : vector<16x32xbf16> to vector<16x8xbf16>
    "tpu.trace_start"() <{level = 10 : i32, message = "id,jd->ij"}> : () -> ()
    %cst_32 = arith.constant dense<0.000000e+00> : vector<16x16xf32>
    %98 = tpu.matmul %96, %97, %cst_32 {dimension_numbers = #tpu.dot_dimension_numbers<[1], [1], [0], [0], [0, 0, 1, 0], [], []>} : vector<16x8xbf16>, vector<16x8xbf16>, vector<16x16xf32> -> vector<16x16xf32>
    "tpu.trace_stop"() : () -> ()
    %99 = arith.addf %98, %50 : vector<16x16xf32>
    %cst_33 = arith.constant dense<0xFF800000> : vector<16xf32>
    %100 = vector.multi_reduction <maximumf>, %99, %cst_33 [1] : vector<16x16xf32> to vector<16xf32>
    %101 = vector.shape_cast %100 : vector<16xf32> to vector<16x1xf32>
    %102 = vector.broadcast %101 : vector<16x1xf32> to vector<16x16xf32>
    %103 = arith.subf %99, %102 : vector<16x16xf32>
    %104 = math.exp %103 : vector<16x16xf32>
    %cst_34 = arith.constant dense<0.000000e+00> : vector<16xf32>
    %105 = vector.multi_reduction <add>, %104, %cst_34 [1] : vector<16x16xf32> to vector<16xf32>
    %106 = vector.shape_cast %105 : vector<16xf32> to vector<16x1xf32>
    %107 = arith.truncf %104 : vector<16x16xf32> to vector<16x16xbf16>
    %108 = vector.extract_strided_slice %12 {offsets = [0, 16], sizes = [16, 8], strides = [1, 1]} : vector<16x32xbf16> to vector<16x8xbf16>
    %cst_35 = arith.constant dense<0.000000e+00> : vector<16x8xf32>
    %109 = tpu.matmul %107, %108, %cst_35 {dimension_numbers = #tpu.dot_dimension_numbers<[1], [0], [0], [1], [0, 0, 1, 1], [], []>} : vector<16x16xbf16>, vector<16x8xbf16>, vector<16x8xf32> -> vector<16x8xf32>
    %110 = tpu.reciprocal %106 {approx = true} : vector<16x1xf32> -> vector<16x1xf32>
    %111 = vector.broadcast %110 : vector<16x1xf32> to vector<16x8xf32>
    %112 = arith.mulf %109, %111 : vector<16x8xf32>
    %113 = arith.truncf %112 : vector<16x8xf32> to vector<16x8xbf16>
    %c2 = arith.constant 2 : index
    %c0_36 = arith.constant 0 : index
    %c0_37 = arith.constant 0 : index
    %114 = vector.load %arg3[%c2, %c0_36, %c0_37] : memref<4x8x32xbf16, #tpu.memory_space<vmem>>, vector<1x8x32xbf16>
    %115 = vector.shape_cast %114 : vector<1x8x32xbf16> to vector<8x32xbf16>
    %cst_38 = arith.constant dense<0.000000e+00> : vector<16x32xf32>
    %116 = tpu.matmul %113, %115, %cst_38 {dimension_numbers = #tpu.dot_dimension_numbers<[1], [0], [0], [1], [0, 0, 1, 1], [], []>} : vector<16x8xbf16>, vector<8x32xbf16>, vector<16x32xf32> -> vector<16x32xf32>
    %117 = arith.addf %95, %116 : vector<16x32xf32>
    %118 = vector.extract_strided_slice %8 {offsets = [0, 24], sizes = [16, 8], strides = [1, 1]} : vector<16x32xbf16> to vector<16x8xbf16>
    %119 = vector.extract_strided_slice %10 {offsets = [0, 24], sizes = [16, 8], strides = [1, 1]} : vector<16x32xbf16> to vector<16x8xbf16>
    "tpu.trace_start"() <{level = 10 : i32, message = "id,jd->ij"}> : () -> ()
    %cst_39 = arith.constant dense<0.000000e+00> : vector<16x16xf32>
    %120 = tpu.matmul %118, %119, %cst_39 {dimension_numbers = #tpu.dot_dimension_numbers<[1], [1], [0], [0], [0, 0, 1, 0], [], []>} : vector<16x8xbf16>, vector<16x8xbf16>, vector<16x16xf32> -> vector<16x16xf32>
    "tpu.trace_stop"() : () -> ()
    %121 = arith.addf %120, %50 : vector<16x16xf32>
    %cst_40 = arith.constant dense<0xFF800000> : vector<16xf32>
    %122 = vector.multi_reduction <maximumf>, %121, %cst_40 [1] : vector<16x16xf32> to vector<16xf32>
    %123 = vector.shape_cast %122 : vector<16xf32> to vector<16x1xf32>
    %124 = vector.broadcast %123 : vector<16x1xf32> to vector<16x16xf32>
    %125 = arith.subf %121, %124 : vector<16x16xf32>
    %126 = math.exp %125 : vector<16x16xf32>
    %cst_41 = arith.constant dense<0.000000e+00> : vector<16xf32>
    %127 = vector.multi_reduction <add>, %126, %cst_41 [1] : vector<16x16xf32> to vector<16xf32>
    %128 = vector.shape_cast %127 : vector<16xf32> to vector<16x1xf32>
    %129 = arith.truncf %126 : vector<16x16xf32> to vector<16x16xbf16>
    %130 = vector.extract_strided_slice %12 {offsets = [0, 24], sizes = [16, 8], strides = [1, 1]} : vector<16x32xbf16> to vector<16x8xbf16>
    %cst_42 = arith.constant dense<0.000000e+00> : vector<16x8xf32>
    %131 = tpu.matmul %129, %130, %cst_42 {dimension_numbers = #tpu.dot_dimension_numbers<[1], [0], [0], [1], [0, 0, 1, 1], [], []>} : vector<16x16xbf16>, vector<16x8xbf16>, vector<16x8xf32> -> vector<16x8xf32>
    %132 = tpu.reciprocal %128 {approx = true} : vector<16x1xf32> -> vector<16x1xf32>
    %133 = vector.broadcast %132 : vector<16x1xf32> to vector<16x8xf32>
    %134 = arith.mulf %131, %133 : vector<16x8xf32>
    %135 = arith.truncf %134 : vector<16x8xf32> to vector<16x8xbf16>
    %c3 = arith.constant 3 : index
    %c0_43 = arith.constant 0 : index
    %c0_44 = arith.constant 0 : index
    %136 = vector.load %arg3[%c3, %c0_43, %c0_44] : memref<4x8x32xbf16, #tpu.memory_space<vmem>>, vector<1x8x32xbf16>
    %137 = vector.shape_cast %136 : vector<1x8x32xbf16> to vector<8x32xbf16>
    %cst_45 = arith.constant dense<0.000000e+00> : vector<16x32xf32>
    %138 = tpu.matmul %135, %137, %cst_45 {dimension_numbers = #tpu.dot_dimension_numbers<[1], [0], [0], [1], [0, 0, 1, 1], [], []>} : vector<16x8xbf16>, vector<8x32xbf16>, vector<16x32xf32> -> vector<16x32xf32>
    %139 = arith.addf %117, %138 : vector<16x32xf32>
    %c0_46 = arith.constant 0 : index
    %c0_47 = arith.constant 0 : index
    %140 = vector.load %arg4[%c0_46, %c0_47] : memref<1x32xf32, #tpu.memory_space<vmem>>, vector<1x32xf32>
    %141 = vector.broadcast %140 : vector<1x32xf32> to vector<16x32xf32>
    %142 = arith.addf %139, %141 : vector<16x32xf32>
    %143 = arith.addf %0, %142 : vector<16x32xf32>
    %cst_48 = arith.constant dense<0.000000e+00> : vector<16xf32>
    %144 = vector.multi_reduction <add>, %143, %cst_48 [1] : vector<16x32xf32> to vector<16xf32>
    %145 = vector.shape_cast %144 : vector<16xf32> to vector<16x1xf32>
    %cst_49 = arith.constant 3.200000e+01 : f32
    %146 = vector.broadcast %cst_49 : f32 to vector<16x1xf32>
    %147 = arith.divf %145, %146 : vector<16x1xf32>
    %148 = vector.broadcast %147 : vector<16x1xf32> to vector<16x32xf32>
    %149 = arith.subf %143, %148 : vector<16x32xf32>
    %150 = arith.mulf %149, %149 : vector<16x32xf32>
    %cst_50 = arith.constant dense<0.000000e+00> : vector<16xf32>
    %151 = vector.multi_reduction <add>, %150, %cst_50 [1] : vector<16x32xf32> to vector<16xf32>
    %152 = vector.shape_cast %151 : vector<16xf32> to vector<16x1xf32>
    %cst_51 = arith.constant 3.200000e+01 : f32
    %153 = vector.broadcast %cst_51 : f32 to vector<16x1xf32>
    %154 = arith.divf %152, %153 : vector<16x1xf32>
    %cst_52 = arith.constant 9.99999974E-6 : f32
    %155 = vector.broadcast %cst_52 : f32 to vector<16x1xf32>
    %156 = arith.addf %154, %155 : vector<16x1xf32>
    %157 = math.rsqrt %156 : vector<16x1xf32>
    %158 = vector.broadcast %157 : vector<16x1xf32> to vector<16x32xf32>
    %159 = arith.mulf %149, %158 : vector<16x32xf32>
    %c0_53 = arith.constant 0 : index
    %c0_54 = arith.constant 0 : index
    %160 = vector.load %arg5[%c0_53, %c0_54] : memref<1x32xf32, #tpu.memory_space<vmem>>, vector<1x32xf32>
    %161 = vector.broadcast %160 : vector<1x32xf32> to vector<16x32xf32>
    %162 = arith.mulf %159, %161 : vector<16x32xf32>
    %c0_55 = arith.constant 0 : index
    %c0_56 = arith.constant 0 : index
    %163 = vector.load %arg6[%c0_55, %c0_56] : memref<1x32xf32, #tpu.memory_space<vmem>>, vector<1x32xf32>
    %164 = vector.broadcast %163 : vector<1x32xf32> to vector<16x32xf32>
    %165 = arith.addf %162, %164 : vector<16x32xf32>
    %cst_57 = arith.constant 0.000000e+00 : f32
    %166 = vector.broadcast %cst_57 : f32 to vector<32x32xf32>
    %c0_58 = arith.constant 0 : index
    %c0_59 = arith.constant 0 : index
    %167 = vector.load %arg17[%c0_58, %c0_59] : memref<32x32xf32, #tpu.memory_space<vmem>>, vector<32x32xf32>
    tpu.vector_store %arg17[%c0_58, %c0_59], %166 {strides = array<i32>} : memref<32x32xf32, #tpu.memory_space<vmem>>, vector<32x32xf32>,
    %c8 = arith.constant 8 : index
    %c0_60 = arith.constant 0 : index
    %168 = vector.load %arg17[%c8, %c0_60] : memref<32x32xf32, #tpu.memory_space<vmem>>, vector<16x32xf32>
    tpu.vector_store %arg17[%c8, %c0_60], %165 {strides = array<i32>} : memref<32x32xf32, #tpu.memory_space<vmem>>, vector<16x32xf32>,
    %c0_61 = arith.constant 0 : index
    %c0_62 = arith.constant 0 : index
    %169 = vector.load %arg17[%c0_61, %c0_62] : memref<32x32xf32, #tpu.memory_space<vmem>>, vector<32x32xf32>
    %170 = vector.extract_strided_slice %169 {offsets = [4, 0], sizes = [16, 32], strides = [1, 1]} : vector<32x32xf32> to vector<16x32xf32>
    %171 = vector.extract_strided_slice %169 {offsets = [6, 0], sizes = [16, 32], strides = [1, 1]} : vector<32x32xf32> to vector<16x32xf32>
    %172 = vector.extract_strided_slice %169 {offsets = [8, 0], sizes = [16, 32], strides = [1, 1]} : vector<32x32xf32> to vector<16x32xf32>
    %173 = vector.extract_strided_slice %169 {offsets = [10, 0], sizes = [16, 32], strides = [1, 1]} : vector<32x32xf32> to vector<16x32xf32>
    %174 = vector.extract_strided_slice %169 {offsets = [12, 0], sizes = [16, 32], strides = [1, 1]} : vector<32x32xf32> to vector<16x32xf32>
    %cst_63 = arith.constant 0.000000e+00 : f32
    %175 = vector.broadcast %cst_63 : f32 to vector<16x128xf32>
    %176 = arith.truncf %170 : vector<16x32xf32> to vector<16x32xbf16>
    %c0_64 = arith.constant 0 : index
    %c0_65 = arith.constant 0 : index
    %c0_66 = arith.constant 0 : index
    %177 = vector.load %arg7[%c0_64, %c0_65, %c0_66] : memref<5x32x128xbf16, #tpu.memory_space<vmem>>, vector<1x32x128xbf16>
    %178 = vector.shape_cast %177 : vector<1x32x128xbf16> to vector<32x128xbf16>
    %cst_67 = arith.constant dense<0.000000e+00> : vector<16x128xf32>
    %179 = tpu.matmul %176, %178, %cst_67 {dimension_numbers = #tpu.dot_dimension_numbers<[1], [0], [0], [1], [0, 0, 1, 1], [], []>} : vector<16x32xbf16>, vector<32x128xbf16>, vector<16x128xf32> -> vector<16x128xf32>
    %180 = arith.addf %175, %179 : vector<16x128xf32>
    %181 = arith.truncf %171 : vector<16x32xf32> to vector<16x32xbf16>
    %c1_68 = arith.constant 1 : index
    %c0_69 = arith.constant 0 : index
    %c0_70 = arith.constant 0 : index
    %182 = vector.load %arg7[%c1_68, %c0_69, %c0_70] : memref<5x32x128xbf16, #tpu.memory_space<vmem>>, vector<1x32x128xbf16>
    %183 = vector.shape_cast %182 : vector<1x32x128xbf16> to vector<32x128xbf16>
    %cst_71 = arith.constant dense<0.000000e+00> : vector<16x128xf32>
    %184 = tpu.matmul %181, %183, %cst_71 {dimension_numbers = #tpu.dot_dimension_numbers<[1], [0], [0], [1], [0, 0, 1, 1], [], []>} : vector<16x32xbf16>, vector<32x128xbf16>, vector<16x128xf32> -> vector<16x128xf32>
    %185 = arith.addf %180, %184 : vector<16x128xf32>
    %186 = arith.truncf %172 : vector<16x32xf32> to vector<16x32xbf16>
    %c2_72 = arith.constant 2 : index
    %c0_73 = arith.constant 0 : index
    %c0_74 = arith.constant 0 : index
    %187 = vector.load %arg7[%c2_72, %c0_73, %c0_74] : memref<5x32x128xbf16, #tpu.memory_space<vmem>>, vector<1x32x128xbf16>
    %188 = vector.shape_cast %187 : vector<1x32x128xbf16> to vector<32x128xbf16>
    %cst_75 = arith.constant dense<0.000000e+00> : vector<16x128xf32>
    %189 = tpu.matmul %186, %188, %cst_75 {dimension_numbers = #tpu.dot_dimension_numbers<[1], [0], [0], [1], [0, 0, 1, 1], [], []>} : vector<16x32xbf16>, vector<32x128xbf16>, vector<16x128xf32> -> vector<16x128xf32>
    %190 = arith.addf %185, %189 : vector<16x128xf32>
    %191 = arith.truncf %173 : vector<16x32xf32> to vector<16x32xbf16>
    %c3_76 = arith.constant 3 : index
    %c0_77 = arith.constant 0 : index
    %c0_78 = arith.constant 0 : index
    %192 = vector.load %arg7[%c3_76, %c0_77, %c0_78] : memref<5x32x128xbf16, #tpu.memory_space<vmem>>, vector<1x32x128xbf16>
    %193 = vector.shape_cast %192 : vector<1x32x128xbf16> to vector<32x128xbf16>
    %cst_79 = arith.constant dense<0.000000e+00> : vector<16x128xf32>
    %194 = tpu.matmul %191, %193, %cst_79 {dimension_numbers = #tpu.dot_dimension_numbers<[1], [0], [0], [1], [0, 0, 1, 1], [], []>} : vector<16x32xbf16>, vector<32x128xbf16>, vector<16x128xf32> -> vector<16x128xf32>
    %195 = arith.addf %190, %194 : vector<16x128xf32>
    %196 = arith.truncf %174 : vector<16x32xf32> to vector<16x32xbf16>
    %c4 = arith.constant 4 : index
    %c0_80 = arith.constant 0 : index
    %c0_81 = arith.constant 0 : index
    %197 = vector.load %arg7[%c4, %c0_80, %c0_81] : memref<5x32x128xbf16, #tpu.memory_space<vmem>>, vector<1x32x128xbf16>
    %198 = vector.shape_cast %197 : vector<1x32x128xbf16> to vector<32x128xbf16>
    %cst_82 = arith.constant dense<0.000000e+00> : vector<16x128xf32>
    %199 = tpu.matmul %196, %198, %cst_82 {dimension_numbers = #tpu.dot_dimension_numbers<[1], [0], [0], [1], [0, 0, 1, 1], [], []>} : vector<16x32xbf16>, vector<32x128xbf16>, vector<16x128xf32> -> vector<16x128xf32>
    %200 = arith.addf %195, %199 : vector<16x128xf32>
    %201 = tpu.iota {dimensions = array<i32: 0>} : vector<16x32xi32>
    %c2_i32_83 = arith.constant 2 : i32
    %202 = vector.broadcast %c2_i32_83 : i32 to vector<16x32xi32>
    %203 = arith.cmpi sge, %201, %202 : vector<16x32xi32>
    %cst_84 = arith.constant -1.000000e+30 : f32
    %204 = vector.broadcast %cst_84 : f32 to vector<16x32xf32>
    %205 = arith.select %203, %171, %204 : vector<16x32xi1>, vector<16x32xf32>
    %c14_i32 = arith.constant 14 : i32
    %206 = vector.broadcast %c14_i32 : i32 to vector<16x32xi32>
    %207 = arith.cmpi slt, %201, %206 : vector<16x32xi32>
    %cst_85 = arith.constant -1.000000e+30 : f32
    %208 = vector.broadcast %cst_85 : f32 to vector<16x32xf32>
    %209 = arith.select %207, %173, %208 : vector<16x32xi1>, vector<16x32xf32>
    %210 = arith.maximumf %205, %209 : vector<16x32xf32>
    %211 = arith.maximumf %172, %210 : vector<16x32xf32>
    %212 = arith.truncf %211 : vector<16x32xf32> to vector<16x32xbf16>
    %c0_86 = arith.constant 0 : index
    %c0_87 = arith.constant 0 : index
    %213 = vector.load %arg8[%c0_86, %c0_87] : memref<32x128xbf16, #tpu.memory_space<vmem>>, vector<32x128xbf16>
    %cst_88 = arith.constant dense<0.000000e+00> : vector<16x128xf32>
    %214 = tpu.matmul %212, %213, %cst_88 {dimension_numbers = #tpu.dot_dimension_numbers<[1], [0], [0], [1], [0, 0, 1, 1], [], []>} : vector<16x32xbf16>, vector<32x128xbf16>, vector<16x128xf32> -> vector<16x128xf32>
    %215 = arith.addf %200, %214 : vector<16x128xf32>
    %c0_89 = arith.constant 0 : index
    %c0_90 = arith.constant 0 : index
    %216 = vector.load %arg9[%c0_89, %c0_90] : memref<1x128xf32, #tpu.memory_space<vmem>>, vector<1x128xf32>
    %217 = vector.broadcast %216 : vector<1x128xf32> to vector<16x128xf32>
    %218 = arith.addf %215, %217 : vector<16x128xf32>
    %cst_91 = arith.constant 0.000000e+00 : f32
    %219 = vector.broadcast %cst_91 : f32 to vector<16x128xf32>
    %220 = arith.maximumf %218, %219 : vector<16x128xf32>
    %221 = arith.truncf %220 : vector<16x128xf32> to vector<16x128xbf16>
    %c0_92 = arith.constant 0 : index
    %c0_93 = arith.constant 0 : index
    %222 = vector.load %arg10[%c0_92, %c0_93] : memref<128x32xbf16, #tpu.memory_space<vmem>>, vector<128x32xbf16>
    %cst_94 = arith.constant dense<0.000000e+00> : vector<16x32xf32>
    %223 = tpu.matmul %221, %222, %cst_94 {dimension_numbers = #tpu.dot_dimension_numbers<[1], [0], [0], [1], [0, 0, 1, 1], [], []>} : vector<16x128xbf16>, vector<128x32xbf16>, vector<16x32xf32> -> vector<16x32xf32>
    %c0_95 = arith.constant 0 : index
    %c0_96 = arith.constant 0 : index
    %224 = vector.load %arg11[%c0_95, %c0_96] : memref<1x32xf32, #tpu.memory_space<vmem>>, vector<1x32xf32>
    %225 = vector.broadcast %224 : vector<1x32xf32> to vector<16x32xf32>
    %226 = arith.addf %223, %225 : vector<16x32xf32>
    %cst_97 = arith.constant 0.000000e+00 : f32
    %227 = vector.broadcast %cst_97 : f32 to vector<16x32xf32>
    %228 = arith.maximumf %226, %227 : vector<16x32xf32>
    %229 = arith.truncf %228 : vector<16x32xf32> to vector<16x32xbf16>
    %c0_98 = arith.constant 0 : index
    %c0_99 = arith.constant 0 : index
    %230 = vector.load %arg12[%c0_98, %c0_99] : memref<32x32xbf16, #tpu.memory_space<vmem>>, vector<32x32xbf16>
    %cst_100 = arith.constant dense<0.000000e+00> : vector<16x32xf32>
    %231 = tpu.matmul %229, %230, %cst_100 {dimension_numbers = #tpu.dot_dimension_numbers<[1], [0], [0], [1], [0, 0, 1, 1], [], []>} : vector<16x32xbf16>, vector<32x32xbf16>, vector<16x32xf32> -> vector<16x32xf32>
    %c0_101 = arith.constant 0 : index
    %c0_102 = arith.constant 0 : index
    %232 = vector.load %arg13[%c0_101, %c0_102] : memref<1x32xf32, #tpu.memory_space<vmem>>, vector<1x32xf32>
    %233 = vector.broadcast %232 : vector<1x32xf32> to vector<16x32xf32>
    %234 = arith.addf %231, %233 : vector<16x32xf32>
    %235 = arith.addf %165, %234 : vector<16x32xf32>
    %cst_103 = arith.constant dense<0.000000e+00> : vector<16xf32>
    %236 = vector.multi_reduction <add>, %235, %cst_103 [1] : vector<16x32xf32> to vector<16xf32>
    %237 = vector.shape_cast %236 : vector<16xf32> to vector<16x1xf32>
    %cst_104 = arith.constant 3.200000e+01 : f32
    %238 = vector.broadcast %cst_104 : f32 to vector<16x1xf32>
    %239 = arith.divf %237, %238 : vector<16x1xf32>
    %240 = vector.broadcast %239 : vector<16x1xf32> to vector<16x32xf32>
    %241 = arith.subf %235, %240 : vector<16x32xf32>
    %242 = arith.mulf %241, %241 : vector<16x32xf32>
    %cst_105 = arith.constant dense<0.000000e+00> : vector<16xf32>
    %243 = vector.multi_reduction <add>, %242, %cst_105 [1] : vector<16x32xf32> to vector<16xf32>
    %244 = vector.shape_cast %243 : vector<16xf32> to vector<16x1xf32>
    %cst_106 = arith.constant 3.200000e+01 : f32
    %245 = vector.broadcast %cst_106 : f32 to vector<16x1xf32>
    %246 = arith.divf %244, %245 : vector<16x1xf32>
    %cst_107 = arith.constant 9.99999974E-6 : f32
    %247 = vector.broadcast %cst_107 : f32 to vector<16x1xf32>
    %248 = arith.addf %246, %247 : vector<16x1xf32>
    %249 = math.rsqrt %248 : vector<16x1xf32>
    %250 = vector.broadcast %249 : vector<16x1xf32> to vector<16x32xf32>
    %251 = arith.mulf %241, %250 : vector<16x32xf32>
    %c0_108 = arith.constant 0 : index
    %c0_109 = arith.constant 0 : index
    %252 = vector.load %arg14[%c0_108, %c0_109] : memref<1x32xf32, #tpu.memory_space<vmem>>, vector<1x32xf32>
    %253 = vector.broadcast %252 : vector<1x32xf32> to vector<16x32xf32>
    %254 = arith.mulf %251, %253 : vector<16x32xf32>
    %c0_110 = arith.constant 0 : index
    %c0_111 = arith.constant 0 : index
    %255 = vector.load %arg15[%c0_110, %c0_111] : memref<1x32xf32, #tpu.memory_space<vmem>>, vector<1x32xf32>
    %256 = vector.broadcast %255 : vector<1x32xf32> to vector<16x32xf32>
    %257 = arith.addf %254, %256 : vector<16x32xf32>
    %c0_112 = arith.constant 0 : index
    %c0_113 = arith.constant 0 : index
    %258 = vector.load %arg16[%c0_112, %c0_113] : memref<16x32xf32, #tpu.memory_space<vmem>>, vector<16x32xf32>
    tpu.vector_store %arg16[%c0_112, %c0_113], %257 {strides = array<i32>} : memref<16x32xf32, #tpu.memory_space<vmem>>, vector<16x32xf32>,
    return
  }
}

</mosaic_0001>

<bundles_post_ra>
// kernel: transformer_encoder_layer.1
= control target key start
LH: loop header
LB: loop body
LE: loop exit
PB: predicated region body
PF: predicated region fallthrough
CT: control target
= control target key end

     0   :  { %s2542_s0 = inlined_call_operand.vmem [shape: f32[16,32], index: 0, kind: input, shape index: {}]   ;;  %s2543_s1 = inlined_call_operand.vmem [shape: bf16[32,96], index: 1, kind: input, shape index: {}]   ;;  %s2544_s2 = inlined_call_operand.vmem [shape: f32[1,96], index: 2, kind: input, shape index: {}]   ;;  %s2545_s3 = inlined_call_operand.vmem [shape: bf16[4,8,32], index: 3, kind: input, shape index: {}]   ;;  %s2546_s4 = inlined_call_operand.vmem [shape: f32[1,32], index: 4, kind: input, shape index: {}]   ;;  %s2547_s5 = inlined_call_operand.vmem [shape: f32[1,32], index: 5, kind: input, shape index: {}]   ;;  %s2548_s6 = inlined_call_operand.vmem [shape: f32[1,32], index: 6, kind: input, shape index: {}]   ;;  %s2549_s7 = inlined_call_operand.vmem [shape: bf16[5,32,128], index: 7, kind: input, shape index: {}]   ;;  %s2550_s8 = inlined_call_operand.hbm [shape: bf16[32,128], index: 8, kind: input, shape index: {}]   ;;  %s2551_s9 = inlined_call_operand.vmem [shape: f32[1,128], index: 9, kind: input, shape index: {}]   ;;  %s2552_s10 = inlined_call_operand.vmem [shape: bf16[128,32], index: 10, kind: input, shape index: {}]   ;;  %s2553_s11 = inlined_call_operand.vmem [shape: f32[1,32], index: 11, kind: input, shape index: {}]   ;;  %s2554_s12 = inlined_call_operand.hbm [shape: bf16[32,32], index: 12, kind: input, shape index: {}]   ;;  %s2555_s13 = inlined_call_operand.vmem [shape: f32[1,32], index: 13, kind: input, shape index: {}]   ;;  %s2556_s14 = inlined_call_operand.vmem [shape: f32[1,32], index: 14, kind: input, shape index: {}]   ;;  %s2557_s15 = inlined_call_operand.vmem [shape: f32[1,32], index: 15, kind: input, shape index: {}]   ;;  %s2558_s16 = inlined_call_operand.hbm [shape: f32[16,32], index: 16, kind: output, shape index: {}]  }
   0x1   :  { %2560 = sst [smem:[#allocation12_spill]] %s2542_s0 }
   0x2   :  { %21 = vsyncpa [#allocation4], 0 }
   0x3   :  { %22 = vsyncpa [#allocation7], 0 }
   0x4   :  { %23 = vsyncpa [#allocation5], 0  ;;  %s2084_s21 = smov [#allocation3]   ;;  %s2012_s25 = scalar_lea.hbm %s2550_s8, 256 }
   0x5   :  { %s45_s22 = sshll.u32 %s2084_s21, 4  ;;  %p2013_p0 = scmp.ne.s32.totalorder %s2550_s8, %s2012_s25  ;;  %s46_s22 = int_to_ptr.vmem [resolvable:$true] %s45_s22 }
   0x6   :  { %p2016_p1 = scmp.lt.u32.totalorder %s2012_s25, %s2550_s8 }
   0x8   :  { %p2018_p2 = pnand %p2016_p1, %p2013_p0 }
   0xa   :  { %2021 = shalt.err (!%p2018_p2)
}
   0xb   :  { %s2022_s30 = scalar_lea.vmem %s46_s22, 256  ;;  %p2027_p4 = scmp.lt.s32.totalorder %s46_s22, %s46_s22 }
   0xc   :  { %p2023_p3 = scmp.ne.s32.totalorder %s46_s22, %s2022_s30  ;;  %p2028_p5 = scmp.lt.s32.totalorder %s2022_s30, %s2022_s30 }
   0xe   :  { %p2029_p6 = por %p2028_p5, %p2027_p4 }
  0x10   :  { %p2030_p7 = pnand %p2029_p6, %p2023_p3 }
  0x12   :  { %2033 = shalt.err (!%p2030_p7)
}
  0x13   :  { %s2085_s0 = smov 64   ;;  %s2086_s17 = smov 4  }
  0x14   :  { %51 = dma.hbm_to_vmem [thread:$0]  %s2550_s8, 256, %s46_s22, [#allocation4], %s2085_s0, %s2085_s0, %s2086_s17  }
  0x15   :  { %s2087_s20 = smov [#allocation6]   ;;  %s2034_s25 = scalar_lea.hbm %s2554_s12, 256 }
  0x16   :  { %s63_s21 = sshll.u32 %s2087_s20, 4  ;;  %p2035_p8 = scmp.ne.s32.totalorder %s2554_s12, %s2034_s25  ;;  %s64_s21 = int_to_ptr.vmem [resolvable:$true] %s63_s21 }
  0x17   :  { %p2038_p9 = scmp.lt.u32.totalorder %s2034_s25, %s2554_s12 }
  0x19   :  { %p2040_p10 = pnand %p2038_p9, %p2035_p8 }
  0x1b   :  { %2043 = shalt.err (!%p2040_p10)
}
  0x1c   :  { %s2044_s30 = scalar_lea.vmem %s64_s21, 256  ;;  %p2049_p12 = scmp.lt.s32.totalorder %s64_s21, %s64_s21 }
  0x1d   :  { %p2045_p11 = scmp.ne.s32.totalorder %s64_s21, %s2044_s30  ;;  %p2050_p13 = scmp.lt.s32.totalorder %s2044_s30, %s2044_s30 }
  0x1f   :  { %p2051_p0 = por %p2050_p13, %p2049_p12 }
  0x21   :  { %p2052_p1 = pnand %p2051_p0, %p2045_p11 }
  0x23   :  { %2055 = shalt.err (!%p2052_p1)
}
  0x24   :  { %69 = dma.hbm_to_vmem [thread:$0]  %s2554_s12, 256, %s64_s21, [#allocation7], %s2085_s0, %s2085_s0, %s2086_s17  }
  0x25   :  { %2078 = dma.done.wait [#allocation4], 256  }
  0x26   :  { %2079 = vsyncadd [#allocation4], 4294967040 }
  0x27   :  { %2080 = dma.done.wait [#allocation7], 256  }
  0x28   :  { %2081 = vsyncadd [#allocation7], 4294967040  ;;  %vm109_vm0 = vcmask 261120   ;;  %v2088_v0 = vmov 0.0   ;;  %vm2089_vm1 = vmmov 0   ;;  %v1948_v1 = vld [vmem:[%s2543_s1] sm:$0xff]   ;;  %v155_v19 = vlaneseq }
  0x29   :  { %1772 = vmatprep.subr.bf16.mxu0 %v2088_v0  ;;  %1776 = vmatprep.mubr.msk.bf16.mxu0 %vm2089_vm1, %v2088_v0  ;;  %945 = vst.msk [vmem:[#allocation2] sm:$0xff] %vm109_vm0, %v2088_v0  ;;  %946 = vst.msk [vmem:[#allocation2 + $0x8] sm:$0xff] %vm109_vm0, %v2088_v0  ;;  %v1949_v2 = vld [vmem:[%s2543_s1 + $0x8] sm:$0xff]   ;;  %s2561_s23 = sld [smem:[#allocation12_spill]]  ;;  %v1643_v6 = vld [vmem:[%s2544_s2] ss:$0 sm:$0xff] }
  0x2a   :  { %947 = vst.msk [vmem:[#allocation2 + $0x10] sm:$0xff] %vm109_vm0, %v2088_v0  ;;  %948 = vst.msk [vmem:[#allocation2 + $0x18] sm:$0xff] %vm109_vm0, %v2088_v0  ;;  %1792 = vmatprep.subr.bf16.mxu1 %v2088_v0  ;;  %1794 = vmatprep.mubr.msk.bf16.mxu1 %vm2089_vm1, %v2088_v0  ;;  %s2090_s27 = smov 120   ;;  %s2091_s28 = smov 96   ;;  %vm203_vm2 = vcmask 64512   ;;  %v2273_v20 = vshrl.u32 %v155_v19, 7 }
  0x2b   :  { %1773 = vmatpush3.bf16.msra.mxu0 %v1948_v1  ;;  %s2092_s29 = smov 88   ;;  %v159_v21 = vand.u32 127, %v155_v19  ;;  %v2093_v26 = vmov -1e+30   ;;  %vm251_vm4 = vcmask 130048   ;;  %s2094_s2 = smov 56  }
  0x2c   :  { %1774 = vmatprep.subr.bf16.mxu0 %v2088_v0  ;;  %v164_v22 = vand.u32 1, %v2273_v20  ;;  %v2277_v24 = vadd.s32 8, %v2273_v20  ;;  %s2096_s30 = smov 80   ;;  %vm451_vm6 = vcmask 1043456   ;;  %s2097_s18 = smov 72   ;;  %vm968_vm7 = vcmask 1044480  }
  0x2d   :  { %v188_v23 = vand.u32 1, %v159_v21  ;;  %s2098_s19 = smov 48   ;;  %s2099_s20 = smov 104   ;;  %vm1028_vm8 = vcmask 1045504   ;;  %vm1293_vm9 = vcmask 1041408   ;;  %vm1288_vm11 = vcmp.ge.s32.totalorder %v2273_v20, 2 }
  0x2e   :  { %v171_v25 = vand.u32 1, %v2277_v24  ;;  %s2100_s21 = smov 40   ;;  %vm1304_vm10 = vcmp.lt.s32.totalorder %v2277_v24, 14  ;;  %vm1160_vm12 = vcmask 1046528   ;;  %v1960_v24 = vld [vmem:[%s2549_s7 + $0x48] sm:$0xff]   ;;  %s2101_s26 = smov [#allocation8]  }
  0x2f   :  { %v2240_v3 = vld [vmem:[%s2561_s23] sm:$0xff]  ;;  %v2245_v4 = vld [vmem:[%s2561_s23 + $0x8] sm:$0xff]  ;;  %1775 = vmatpush3.bf16.msra.mxu0 %v1949_v2  ;;  %vm196_vm3 = vcmp.eq.s32.totalorder %v164_v22, %v188_v23 }
  0x30   :  { %v85_v5 = vpack.c.bf16 %v2245_v4, %v2240_v3  ;;  %1780 = vmatprep.subr.bf16.mxu0 %v2088_v0  ;;  %v2280_v27 = vsel %vm196_vm3, 0.0, %v2093_v26  ;;  %vm197_vm5 = vcmp.eq.s32.totalorder %v171_v25, %v188_v23 }
  0x31   :  { %v2284_v34 = vsel %vm197_vm5, 0.0, %v2093_v26 }
  0x32   :  { %1777 = vmatmul.mubr.msk.bf16.vlgmr.msra.gmra.mrb[0].mxu0 %vm109_vm0, %v85_v5 }
  0x33   :  { %1782 = vmatprep.mubr.msk.bf16.mxu0 %vm2089_vm1, %v2088_v0 }
 0x105   :  { %v147_v7 = vpop.f32.mrb[0].mxu0 }
 0x106   :  { %v1778_v8 = vpop.f32.mrb[1].mxu0  ;;  %v148_v10 = vadd.f32 %v1643_v6, %v147_v7 }
 0x107   :  { %v150_v9 = vpop.f32.mrb[2].mxu0  ;;  %v323_v8 = vld [vmem:[%s2545_s3] sm:$0xf] }
 0x108   :  { %v151_v11 = vadd.f32 %v1643_v6, %v150_v9  ;;  %v1779_v12 = vpop.f32.mrb[3].mxu0  ;;  %v500_v9 = vsel %vm451_vm6, %v323_v8, 0 }
 0x10a   :  { %v2257_v13 = vpack.c.bf16 %v151_v11, %v148_v10  ;;  %v1651_v10 = vld [vmem:[%s2545_s3 + $0x4] sm:$0xf] }
 0x10b   :  { %v453_v11 = vsel %vm451_vm6, %v1651_v10, 0 }
 0x10c   :  { %324 = vrot.lane.b32.xlu1 %v2257_v13, %s2090_s27  ;;  %201 = vrot.lane.b32.xlu0 %v2257_v13, %s2091_s28 }
 0x110   :  { %326 = vrot.lane.b32.xlu0 %v2257_v13, %s2092_s29 }
 0x17e   :  { %v202_v14 = vpop.permute.xlu0 %201  ;;  %v325_v18 = vpop.permute.xlu1 %324 }
 0x17f   :  { %v208_v15 = vsel %vm203_vm2, %v202_v14, 0 }
 0x180   :  { %1781 = vmatpush3.bf16.xpose.msra.mxu0 %v208_v15 }
 0x181   :  { %1786 = vmatprep.subr.bf16.mxu0 %v2088_v0 }
 0x182   :  { %v327_v16 = vpop.permute.xlu0 %326 }
 0x183   :  { %v332_v17 = vsel %vm203_vm2, %v327_v16, 0 }
 0x184   :  { %1793 = vmatpush3.bf16.xpose.msra.mxu1 %v332_v17 }
 0x185   :  { %1804 = vmatprep.subr.bf16.mxu1 %v2088_v0 }
 0x187   :  { %1783 = vmatmul.mubr.msk.bf16.vlgmr.msra.gmra.mrb[4].mxu0 %vm203_vm2, %v2257_v13 }
 0x188   :  { %1788 = vmatprep.mubr.msk.bf16.mxu0 %vm2089_vm1, %v2088_v0 }
 0x18b   :  { %1795 = vmatmul.mubr.msk.bf16.vlgmr.msra.gmra.mrb[0].mxu1 %vm203_vm2, %v325_v18 }
 0x18c   :  { %1806 = vmatprep.mubr.msk.bf16.mxu1 %vm2089_vm1, %v2088_v0  ;;  %1805 = vmatpush3.bf16.msra.mxu1 %v453_v11 }
 0x18d   :  { %1816 = vmatprep.subr.bf16.mxu1 %v2088_v0 }
 0x25a   :  { %v244_v28 = vpop.f32.mrb[4].mxu0 }
 0x25b   :  { %v245_v29 = vadd.f32 %v244_v28, %v2280_v27  ;;  %v1784_v30 = vpop.f32.mrb[5].mxu0 }
 0x25c   :  { %v247_v31 = vpop.f32.mrb[6].mxu0 }
 0x25d   :  { %v1785_v32 = vpop.f32.mrb[7].mxu0  ;;  %v252_v33 = vsel %vm251_vm4, %v245_v29, -inf  ;;  %v248_v39 = vadd.f32 %v247_v31, %v2284_v34 }
 0x25e   :  { %v368_v35 = vpop.f32.mrb[0].mxu1  ;;  %253 = vmax.xlane.f32.xlu1 %v252_v33 }
 0x25f   :  { %v369_v36 = vadd.f32 %v368_v35, %v2280_v27  ;;  %v1796_v37 = vpop.f32.mrb[1].mxu1  ;;  %v255_v44 = vsel %vm251_vm4, %v248_v39, -inf }
 0x260   :  { %v371_v38 = vpop.f32.mrb[2].mxu1 }
 0x261   :  { %v372_v40 = vadd.f32 %v371_v38, %v2284_v34  ;;  %v1797_v41 = vpop.f32.mrb[3].mxu1  ;;  %v375_v42 = vsel %vm251_vm4, %v369_v36, -inf }
 0x262   :  { %376 = vmax.xlane.f32.xlu0 %v375_v42 }
 0x263   :  { %v378_v43 = vsel %vm251_vm4, %v372_v40, -inf }
 0x264   :  { %379 = vmax.xlane.f32.xlu1 %v378_v43 }
 0x266   :  { %256 = vmax.xlane.f32.xlu0 %v255_v44 }
 0x275   :  { %394 = vrot.lane.b32.xlu1 %v2257_v13, %s2094_s2 }
 0x27c   :  { %271 = vrot.lane.b32.xlu0 %v2257_v13, %s2085_s0  ;;  %s2095_s0 = smov 112  }
 0x2eb   :  { %v254_v45 = vpop.xlane.xlu1 %253 }
 0x2ec   :  { %v258_v46 = vsub.f32 %v245_v29, %v254_v45 }
 0x2ee   :  { %v260_v52 = vmul.f32 1.442695, %v258_v46 }
 0x2ef   :  { %v377_v47 = vpop.xlane.xlu0 %376 }
 0x2f0   :  { %v381_v48 = vsub.f32 %v369_v36, %v377_v47 }
 0x2f1   :  { %v380_v49 = vpop.xlane.xlu1 %379 }
 0x2f2   :  { %v383_v50 = vmul.f32 1.442695, %v381_v48  ;;  %v382_v51 = vsub.f32 %v372_v40, %v380_v49 }
 0x2f3   :  { %v257_v53 = vpop.xlane.xlu0 %256 }
 0x2f4   :  { %1972 = vpow2.f32 %v383_v50  ;;  %v385_v54 = vmul.f32 1.442695, %v382_v51  ;;  %v259_v55 = vsub.f32 %v248_v39, %v257_v53 }
 0x2f5   :  { %v395_v2 = vpop.permute.xlu1 %394 }
 0x2f6   :  { %1974 = vpow2.f32 %v385_v54  ;;  %v262_v56 = vmul.f32 1.442695, %v259_v55 }
 0x2f7   :  { %1976 = vpow2.f32 %v260_v52  ;;  %v272_v57 = vpop.permute.xlu0 %271 }
 0x2f8   :  { %1978 = vpow2.f32 %v262_v56  ;;  %1787 = vmatpush3.bf16.msra.mxu0 %v272_v57 }
 0x2f9   :  { %1798 = vmatprep.subr.bf16.mxu0 %v2088_v0 }
 0x2fe   :  { %v1973_v58 = vpop.eup %1972 }
 0x2ff   :  { %v387_v59 = vsel %vm251_vm4, %v1973_v58, 0.0 }
 0x300   :  { %v1975_v60 = vpop.eup %1974  ;;  %388 = vadd.xlane.f32.xlu1 %v387_v59 }
 0x301   :  { %v1977_v61 = vpop.eup %1976  ;;  %v390_v62 = vsel %vm251_vm4, %v1975_v60, 0.0  ;;  %v393_v5 = vpack.c.bf16 %v1975_v60, %v1973_v58 }
 0x302   :  { %v1979_v63 = vpop.eup %1978  ;;  %391 = vadd.xlane.f32.xlu0 %v390_v62  ;;  %v264_v6 = vsel %vm251_vm4, %v1977_v61, 0.0 }
 0x303   :  { %v270_v1 = vpack.c.bf16 %v1979_v63, %v1977_v61  ;;  %v267_v7 = vsel %vm251_vm4, %v1979_v63, 0.0 }
 0x305   :  { %1789 = vmatmul.mubr.msk.bf16.vlgmr.msra.gmra.mrb[8].mxu0 %vm251_vm4, %v270_v1 }
 0x306   :  { %1799 = vmatpush3.bf16.msra.mxu0 %v395_v2  ;;  %1800 = vmatprep.mubr.msk.bf16.mxu0 %vm2089_vm1, %v2088_v0 }
 0x307   :  { %1810 = vmatprep.subr.bf16.mxu0 %v2088_v0 }
 0x30d   :  { %1801 = vmatmul.mubr.msk.bf16.vlgmr.msra.gmra.mrb[12].mxu0 %vm251_vm4, %v393_v5 }
 0x30e   :  { %1812 = vmatprep.mubr.msk.bf16.mxu0 %vm2089_vm1, %v2088_v0  ;;  %1811 = vmatpush3.bf16.msra.mxu0 %v500_v9 }
 0x30f   :  { %1822 = vmatprep.subr.bf16.mxu0 %v2088_v0 }
 0x311   :  { %543 = vrot.lane.b32.xlu1 %v2257_v13, %s2095_s0 }
 0x318   :  { %545 = vrot.lane.b32.xlu0 %v2257_v13, %s2096_s30 }
 0x335   :  { %265 = vadd.xlane.f32.xlu1 %v264_v6 }
 0x337   :  { %268 = vadd.xlane.f32.xlu0 %v267_v7 }
 0x38d   :  { %v389_v12 = vpop.xlane.xlu1 %388 }
 0x38f   :  { %v392_v14 = vpop.xlane.xlu0 %391 }
 0x391   :  { %v544_v15 = vpop.permute.xlu1 %543 }
 0x393   :  { %v546_v16 = vpop.permute.xlu0 %545 }
 0x394   :  { %v551_v41 = vsel %vm203_vm2, %v546_v16, 0 }
 0x3c2   :  { %v266_v17 = vpop.xlane.xlu1 %265 }
 0x3c3   :  { %1980 = vrcp.f32 %v266_v17 }
 0x3c4   :  { %v269_v18 = vpop.xlane.xlu0 %268 }
 0x3c5   :  { %1982 = vrcp.f32 %v269_v18 }
 0x3c6   :  { %1984 = vrcp.f32 %v389_v12 }
 0x3c7   :  { %1986 = vrcp.f32 %v392_v14 }
 0x3cd   :  { %v1981_v21 = vpop.eup %1980 }
 0x3cf   :  { %v1983_v23 = vpop.eup %1982 }
 0x3d0   :  { %v1985_v32 = vpop.eup %1984 }
 0x3d1   :  { %v1987_v35 = vpop.eup %1986 }
 0x3d8   :  { %v311_v19 = vpop.f32.mrb[8].mxu0 }
 0x3d9   :  { %v1790_v22 = vpop.f32.mrb[9].mxu0  ;;  %v320_v26 = vmul.f32 %v1981_v21, %v311_v19 }
 0x3da   :  { %v314_v25 = vpop.f32.mrb[10].mxu0 }
 0x3db   :  { %v321_v28 = vmul.f32 %v1983_v23, %v314_v25  ;;  %v1791_v29 = vpop.f32.mrb[11].mxu0 }
 0x3dd   :  { %v322_v30 = vpack.c.bf16 %v321_v28, %v320_v26 }
 0x3df   :  { %1813 = vmatmul.mubr.msk.bf16.vlgmr.msra.gmra.mrb[16].mxu0 %vm203_vm2, %v322_v30 }
 0x3e0   :  { %v434_v31 = vpop.f32.mrb[12].mxu0  ;;  %1824 = vmatprep.mubr.msk.bf16.mxu0 %vm2089_vm1, %v2088_v0 }
 0x3e1   :  { %v1802_v33 = vpop.f32.mrb[13].mxu0  ;;  %v443_v37 = vmul.f32 %v1985_v32, %v434_v31 }
 0x3e2   :  { %v437_v36 = vpop.f32.mrb[14].mxu0 }
 0x3e3   :  { %v444_v38 = vmul.f32 %v1987_v35, %v437_v36  ;;  %v1803_v39 = vpop.f32.mrb[15].mxu0 }
 0x3e5   :  { %v445_v40 = vpack.c.bf16 %v444_v38, %v443_v37 }
 0x3e7   :  { %1807 = vmatmul.mubr.msk.bf16.vlgmr.msra.gmra.mrb[4].mxu1 %vm203_vm2, %v445_v40 }
 0x3e8   :  { %1817 = vmatpush3.bf16.xpose.msra.mxu1 %v551_v41  ;;  %1818 = vmatprep.mubr.msk.bf16.mxu1 %vm2089_vm1, %v2088_v0 }
 0x3e9   :  { %1828 = vmatprep.subr.bf16.mxu1 %v2088_v0 }
 0x3ef   :  { %1819 = vmatmul.mubr.msk.bf16.vlgmr.msra.gmra.mrb[8].mxu1 %vm203_vm2, %v544_v15  ;;  %v1656_v15 = vld [vmem:[%s2545_s3 + $0x8] sm:$0xf] }
 0x3f0   :  { %1830 = vmatprep.mubr.msk.bf16.mxu1 %vm2089_vm1, %v2088_v0  ;;  %v671_v16 = vsel %vm451_vm6, %v1656_v15, 0 }
 0x3f1   :  { %1829 = vmatpush3.bf16.msra.mxu1 %v671_v16 }
 0x3f2   :  { %1840 = vmatprep.subr.bf16.mxu1 %v2088_v0 }
 0x4b2   :  { %v536_v42 = vpop.f32.mrb[16].mxu0 }
 0x4b3   :  { %v1814_v43 = vpop.f32.mrb[17].mxu0 }
 0x4b4   :  { %v539_v44 = vpop.f32.mrb[18].mxu0 }
 0x4b5   :  { %v1815_v45 = vpop.f32.mrb[19].mxu0 }
 0x4ba   :  { %v489_v46 = vpop.f32.mrb[4].mxu1 }
 0x4bb   :  { %v2330_v47 = vadd.f32 %v536_v42, %v489_v46  ;;  %v1808_v48 = vpop.f32.mrb[5].mxu1 }
 0x4bc   :  { %v492_v49 = vpop.f32.mrb[6].mxu1 }
 0x4bd   :  { %v2332_v50 = vadd.f32 %v539_v44, %v492_v49  ;;  %v1809_v51 = vpop.f32.mrb[7].mxu1 }
 0x4be   :  { %v1660_v51 = vld [vmem:[%s2545_s3 + $0xc] sm:$0xf] }
 0x4c2   :  { %v587_v52 = vpop.f32.mrb[8].mxu1 }
 0x4c3   :  { %v588_v53 = vadd.f32 %v587_v52, %v2280_v27  ;;  %v1820_v54 = vpop.f32.mrb[9].mxu1  ;;  %v844_v52 = vsel %vm451_vm6, %v1660_v51, 0 }
 0x4c4   :  { %v590_v55 = vpop.f32.mrb[10].mxu1 }
 0x4c5   :  { %v591_v56 = vadd.f32 %v590_v55, %v2284_v34  ;;  %v1821_v57 = vpop.f32.mrb[11].mxu1  ;;  %v594_v58 = vsel %vm251_vm4, %v588_v53, -inf }
 0x4c6   :  { %595 = vmax.xlane.f32.xlu0 %v594_v58 }
 0x4c7   :  { %v597_v59 = vsel %vm251_vm4, %v591_v56, -inf }
 0x4c8   :  { %598 = vmax.xlane.f32.xlu1 %v597_v59 }
 0x4d9   :  { %718 = vrot.lane.b32.xlu1 %v2257_v13, %s2097_s18 }
 0x4dc   :  { %613 = vrot.lane.b32.xlu0 %v2257_v13, %s2098_s19 }
 0x4dd   :  { %716 = vrot.lane.b32.xlu1 %v2257_v13, %s2099_s20 }
 0x553   :  { %v596_v60 = vpop.xlane.xlu0 %595 }
 0x554   :  { %v600_v61 = vsub.f32 %v588_v53, %v596_v60 }
 0x555   :  { %v599_v62 = vpop.xlane.xlu1 %598 }
 0x556   :  { %v602_v63 = vmul.f32 1.442695, %v600_v61  ;;  %v601_v1 = vsub.f32 %v591_v56, %v599_v62 }
 0x557   :  { %v614_v2 = vpop.permute.xlu0 %613 }
 0x558   :  { %1988 = vpow2.f32 %v602_v63  ;;  %v604_v5 = vmul.f32 1.442695, %v601_v1  ;;  %1823 = vmatpush3.bf16.msra.mxu0 %v614_v2 }
 0x559   :  { %1834 = vmatprep.subr.bf16.mxu0 %v2088_v0  ;;  %v719_v9 = vpop.permute.xlu1 %718 }
 0x55a   :  { %1990 = vpow2.f32 %v604_v5  ;;  %v724_v12 = vsel %vm203_vm2, %v719_v9, 0 }
 0x55d   :  { %v717_v14 = vpop.permute.xlu1 %716 }
 0x562   :  { %v1989_v6 = vpop.eup %1988 }
 0x563   :  { %v606_v7 = vsel %vm251_vm4, %v1989_v6, 0.0 }
 0x564   :  { %v1991_v8 = vpop.eup %1990  ;;  %607 = vadd.xlane.f32.xlu0 %v606_v7 }
 0x565   :  { %v609_v10 = vsel %vm251_vm4, %v1991_v8, 0.0  ;;  %v612_v11 = vpack.c.bf16 %v1991_v8, %v1989_v6 }
 0x566   :  { %610 = vadd.xlane.f32.xlu1 %v609_v10 }
 0x567   :  { %1825 = vmatmul.mubr.msk.bf16.vlgmr.msra.gmra.mrb[20].mxu0 %vm251_vm4, %v612_v11 }
 0x568   :  { %1835 = vmatpush3.bf16.xpose.msra.mxu0 %v724_v12  ;;  %1836 = vmatprep.mubr.msk.bf16.mxu0 %vm2089_vm1, %v2088_v0 }
 0x569   :  { %1846 = vmatprep.subr.bf16.mxu0 %v2088_v0 }
 0x56f   :  { %1837 = vmatmul.mubr.msk.bf16.vlgmr.msra.gmra.mrb[24].mxu0 %vm203_vm2, %v717_v14 }
 0x570   :  { %1848 = vmatprep.mubr.msk.bf16.mxu0 %vm2089_vm1, %v2088_v0  ;;  %1847 = vmatpush3.bf16.msra.mxu0 %v844_v52  ;;  %v951_v52 = vld [vmem:[#allocation2] sm:$0xff] }
 0x571   :  { %1860 = vmatprep.subr.bf16.mxu0 %v2088_v0 }
 0x577   :  { %786 = vrot.lane.b32.xlu1 %v2257_v13, %s2100_s21 }
 0x5f1   :  { %v608_v17 = vpop.xlane.xlu0 %607 }
 0x5f2   :  { %1992 = vrcp.f32 %v608_v17 }
 0x5f3   :  { %v611_v18 = vpop.xlane.xlu1 %610 }
 0x5f4   :  { %1994 = vrcp.f32 %v611_v18 }
 0x5f7   :  { %v787_v30 = vpop.permute.xlu1 %786 }
 0x5fc   :  { %v1993_v21 = vpop.eup %1992 }
 0x5fe   :  { %v1995_v23 = vpop.eup %1994 }
 0x63a   :  { %v653_v19 = vpop.f32.mrb[20].mxu0 }
 0x63b   :  { %v1826_v22 = vpop.f32.mrb[21].mxu0  ;;  %v662_v26 = vmul.f32 %v1993_v21, %v653_v19 }
 0x63c   :  { %v656_v25 = vpop.f32.mrb[22].mxu0 }
 0x63d   :  { %v663_v13 = vmul.f32 %v1995_v23, %v656_v25  ;;  %v1827_v28 = vpop.f32.mrb[23].mxu0 }
 0x63f   :  { %v664_v29 = vpack.c.bf16 %v663_v13, %v662_v26 }
 0x641   :  { %1831 = vmatmul.mubr.msk.bf16.vlgmr.msra.gmra.mrb[12].mxu1 %vm203_vm2, %v664_v29 }
 0x642   :  { %1841 = vmatpush3.bf16.msra.mxu1 %v787_v30  ;;  %v760_v31 = vpop.f32.mrb[24].mxu0  ;;  %1842 = vmatprep.mubr.msk.bf16.mxu1 %vm2089_vm1, %v2088_v0 }
 0x643   :  { %v761_v32 = vadd.f32 %v760_v31, %v2280_v27  ;;  %v1838_v33 = vpop.f32.mrb[25].mxu0  ;;  %1852 = vmatprep.subr.bf16.mxu1 %v2088_v0 }
 0x644   :  { %v763_v35 = vpop.f32.mrb[26].mxu0  ;;  %v1952_v33 = vld [vmem:[%s2549_s7 + $0x18] sm:$0xff]  }
 0x645   :  { %v764_v36 = vadd.f32 %v763_v35, %v2284_v34  ;;  %v1839_v37 = vpop.f32.mrb[27].mxu0  ;;  %v767_v38 = vsel %vm251_vm4, %v761_v32, -inf  ;;  %v1953_v35 = vld [vmem:[%s2549_s7 + $0x8] sm:$0xff]  }
 0x646   :  { %768 = vmax.xlane.f32.xlu0 %v767_v38 }
 0x647   :  { %v770_v39 = vsel %vm251_vm4, %v764_v36, -inf }
 0x64a   :  { %771 = vmax.xlane.f32.xlu0 %v770_v39 }
 0x6d3   :  { %v769_v40 = vpop.xlane.xlu0 %768 }
 0x6d4   :  { %v773_v41 = vsub.f32 %v761_v32, %v769_v40  ;;  %v1951_v32 = vld [vmem:[%s2549_s7] sm:$0xff]  }
 0x6d6   :  { %v775_v42 = vmul.f32 1.442695, %v773_v41 }
 0x6d7   :  { %v772_v43 = vpop.xlane.xlu0 %771 }
 0x6d8   :  { %1996 = vpow2.f32 %v775_v42  ;;  %v774_v44 = vsub.f32 %v764_v36, %v772_v43  ;;  %v1663_v43 = vld [vmem:[%s2547_s5] ss:$0 sm:$0xff] }
 0x6da   :  { %v777_v27 = vmul.f32 1.442695, %v774_v44 }
 0x6dc   :  { %1998 = vpow2.f32 %v777_v27  ;;  %v1664_v27 = vld [vmem:[%s2548_s6] ss:$0 sm:$0xff] }
 0x6e2   :  { %v1997_v45 = vpop.eup %1996 }
 0x6e3   :  { %v779_v46 = vsel %vm251_vm4, %v1997_v45, 0.0 }
 0x6e4   :  { %780 = vadd.xlane.f32.xlu0 %v779_v46 }
 0x6e6   :  { %v1999_v34 = vpop.eup %1998 }
 0x6e7   :  { %v782_v48 = vsel %vm251_vm4, %v1999_v34, 0.0  ;;  %v785_v49 = vpack.c.bf16 %v1999_v34, %v1997_v45 }
 0x6e8   :  { %783 = vadd.xlane.f32.xlu0 %v782_v48 }
 0x6e9   :  { %1843 = vmatmul.mubr.msk.bf16.vlgmr.msra.gmra.mrb[16].mxu1 %vm251_vm4, %v785_v49 }
 0x6ea   :  { %1856 = vmatprep.mubr.msk.bf16.mxu1 %vm2089_vm1, %v2088_v0 }
 0x714   :  { %v707_v53 = vpop.f32.mrb[12].mxu1 }
 0x715   :  { %v714_v54 = vadd.f32 %v707_v53, %v2330_v47  ;;  %v1832_v55 = vpop.f32.mrb[13].mxu1 }
 0x716   :  { %v710_v56 = vpop.f32.mrb[14].mxu1  ;;  %v954_v55 = vld [vmem:[#allocation2 + $0x18] sm:$0xff] }
 0x717   :  { %v715_v57 = vadd.f32 %v710_v56, %v2332_v50  ;;  %v1833_v58 = vpop.f32.mrb[15].mxu1  ;;  %v1662_v50 = vld [vmem:[%s2546_s4] ss:$0 sm:$0xff]  ;;  %s1630_s4 = sshll.u32 %s2101_s26, 4  ;;  %s1631_s4 = int_to_ptr.vmem [resolvable:$true] %s1630_s4 }
 0x718   :  { %s2056_s27 = scalar_lea.vmem %s1631_s4, 256  ;;  %p2061_p3 = scmp.lt.s32.totalorder %s1631_s4, %s1631_s4 }
 0x719   :  { %p2057_p2 = scmp.ne.s32.totalorder %s1631_s4, %s2056_s27  ;;  %p2062_p4 = scmp.lt.s32.totalorder %s2056_s27, %s2056_s27 }
 0x71b   :  { %p2063_p5 = por %p2062_p4, %p2061_p3 }
 0x71d   :  { %p2064_p6 = pnand %p2063_p5, %p2057_p2 }
 0x771   :  { %v781_v59 = vpop.xlane.xlu0 %780 }
 0x772   :  { %2000 = vrcp.f32 %v781_v59  ;;  %v1310_v59 = vrot.slane %v954_v55, 2 }
 0x775   :  { %v784_v60 = vpop.xlane.xlu0 %783 }
 0x776   :  { %2002 = vrcp.f32 %v784_v60 }
 0x77c   :  { %v2001_v62 = vpop.eup %2000 }
 0x780   :  { %v2003_v1 = vpop.eup %2002 }
 0x7bc   :  { %v826_v61 = vpop.f32.mrb[16].mxu1 }
 0x7bd   :  { %v1844_v63 = vpop.f32.mrb[17].mxu1  ;;  %v835_v5 = vmul.f32 %v2001_v62, %v826_v61 }
 0x7be   :  { %v829_v2 = vpop.f32.mrb[18].mxu1 }
 0x7bf   :  { %v836_v6 = vmul.f32 %v2003_v1, %v829_v2  ;;  %v1845_v7 = vpop.f32.mrb[19].mxu1  ;;  %v1954_v1 = vld [vmem:[%s2549_s7 + $0x20] sm:$0xff]   ;;  %v1955_v2 = vld [vmem:[%s2549_s7 + $0x30] sm:$0xff]  }
 0x7c0   :  { %v1152_v7 = vpack.c.bf16 %v954_v55, %v954_v55 }
 0x7c1   :  { %v837_v8 = vpack.c.bf16 %v836_v6, %v835_v5  ;;  %v1294_v5 = vrot.slane %v951_v52, 6 }
 0x7c3   :  { %1849 = vmatmul.mubr.msk.bf16.vlgmr.msra.gmra.mrb[28].mxu0 %vm203_vm2, %v837_v8 }
 0x7c4   :  { %1864 = vmatprep.mubr.msk.bf16.mxu0 %vm2089_vm1, %v2088_v0  ;;  %1861 = vmatpush3.bf16.msra.mxu0 %v1951_v32 }
 0x7c5   :  { %1862 = vmatprep.subr.bf16.mxu0 %v2088_v0 }
 0x7c8   :  { %1863 = vmatpush3.bf16.msra.mxu0 %v1953_v35  ;;  %v1963_v35 = vld [vmem:[%s2552_s10 + $0x8] sm:$0xff]  }
 0x7c9   :  { %1876 = vmatprep.subr.bf16.mxu0 %v2088_v0 }
 0x896   :  { %v880_v47 = vpop.f32.mrb[28].mxu0 }
 0x897   :  { %v887_v9 = vadd.f32 %v880_v47, %v714_v54  ;;  %v1850_v10 = vpop.f32.mrb[29].mxu0 }
 0x898   :  { %v883_v11 = vpop.f32.mrb[30].mxu0 }
 0x899   :  { %v896_v12 = vadd.f32 %v1662_v50, %v887_v9  ;;  %v888_v14 = vadd.f32 %v883_v11, %v715_v57  ;;  %v1851_v15 = vpop.f32.mrb[31].mxu0 }
 0x89b   :  { %v897_v16 = vadd.f32 %v1662_v50, %v888_v14  ;;  %v898_v17 = vadd.f32 %v896_v12, %v2240_v3  ;;  %v1956_v12 = vld [vmem:[%s2549_s7 + $0x28] sm:$0xff]   ;;  %v1957_v14 = vld [vmem:[%s2549_s7 + $0x38] sm:$0xff]  }
 0x89d   :  { %v900_v18 = vsel %vm109_vm0, %v898_v17, 0.0  ;;  %v899_v19 = vadd.f32 %v897_v16, %v2245_v4  ;;  %v1950_v4 = vld [vmem:[%s2549_s7 + $0x10] sm:$0xff]   ;;  %v1162_v16 = vrot.slane %v1152_v7, 1 }
 0x89e   :  { %901 = vadd.xlane.f32.xlu0 %v900_v18  ;;  %1853 = vmatpush3.bf16.msra.mxu1 %v1950_v4  ;;  %v1962_v4 = vld [vmem:[%s2552_s10] sm:$0xff]  }
 0x89f   :  { %v903_v21 = vsel %vm109_vm0, %v899_v19, 0.0  ;;  %1854 = vmatprep.subr.bf16.mxu1 %v2088_v0 }
 0x8a2   :  { %904 = vadd.xlane.f32.xlu0 %v903_v21  ;;  %1855 = vmatpush3.bf16.msra.mxu1 %v1952_v33 }
 0x8a3   :  { %1868 = vmatprep.subr.bf16.mxu1 %v2088_v0 }
 0x92b   :  { %v902_v22 = vpop.xlane.xlu0 %901 }
 0x92c   :  { %v907_v23 = vmul.f32 0.03125, %v902_v22  ;;  %v1958_v22 = vld [vmem:[%s2549_s7 + $0x40] sm:$0xff]  }
 0x92e   :  { %v909_v25 = vsub.f32 %v898_v17, %v907_v23  ;;  %v1959_v23 = vld [vmem:[#allocation3] sm:$0xff]  }
 0x92f   :  { %v905_v26 = vpop.xlane.xlu0 %904 }
 0x930   :  { %v908_v13 = vmul.f32 0.03125, %v905_v26  ;;  %v911_v28 = vmul.f32 %v909_v25, %v909_v25 }
 0x932   :  { %v910_v29 = vsub.f32 %v899_v19, %v908_v13  ;;  %v913_v30 = vsel %vm109_vm0, %v911_v28, 0.0  ;;  %v1961_v28 = vld [vmem:[#allocation3 + $0x8] sm:$0xff]  }
 0x933   :  { %914 = vadd.xlane.f32.xlu1 %v913_v30 }
 0x934   :  { %v912_v31 = vmul.f32 %v910_v29, %v910_v29 }
 0x936   :  { %v916_v3 = vsel %vm109_vm0, %v912_v31, 0.0 }
 0x937   :  { %917 = vadd.xlane.f32.xlu0 %v916_v3  ;;  %v1228_v3 = vrot.slane %v1152_v7, 2 }
 0x9c0   :  { %v915_v36 = vpop.xlane.xlu1 %914 }
 0x9c1   :  { %v919_v37 = vmul.f32 0.03125, %v915_v36  ;;  %v1964_v36 = vld [vmem:[%s2552_s10 + $0x10] sm:$0xff]  }
 0x9c3   :  { %v921_v38 = vadd.f32 1e-05, %v919_v37  ;;  %v1965_v37 = vld [vmem:[%s2552_s10 + $0x18] sm:$0xff]  }
 0x9c4   :  { %v918_v39 = vpop.xlane.xlu0 %917 }
 0x9c5   :  { %2004 = vrsqrt.f32 %v921_v38  ;;  %v920_v40 = vmul.f32 0.03125, %v918_v39  ;;  %v1966_v38 = vld [vmem:[%s2552_s10 + $0x20] sm:$0xff]   ;;  %v1967_v39 = vld [vmem:[%s2552_s10 + $0x28] sm:$0xff]  }
 0x9c7   :  { %v922_v41 = vadd.f32 1e-05, %v920_v40  ;;  %v1968_v40 = vld [vmem:[%s2552_s10 + $0x30] sm:$0xff]  }
 0x9c9   :  { %2006 = vrsqrt.f32 %v922_v41  ;;  %v1969_v41 = vld [vmem:[%s2552_s10 + $0x38] sm:$0xff]  }
 0x9cf   :  { %v2005_v42 = vpop.eup %2004 }
 0x9d0   :  { %v925_v44 = vmul.f32 %v2005_v42, %v909_v25 }
 0x9d2   :  { %v934_v45 = vmul.f32 %v1663_v43, %v925_v44 }
 0x9d3   :  { %v2007_v46 = vpop.eup %2006 }
 0x9d4   :  { %v2412_v34 = vadd.f32 %v1664_v27, %v934_v45  ;;  %v926_v48 = vmul.f32 %v2007_v46, %v910_v29 }
 0x9d6   :  { %949 = vst.msk [vmem:[#allocation2 + $0x8] sm:$0xff] %vm109_vm0, %v2412_v34  ;;  %v935_v49 = vmul.f32 %v1663_v43, %v926_v48 }
 0x9d8   :  { %v2416_v51 = vadd.f32 %v1664_v27, %v935_v49 }
 0x9da   :  { %950 = vst.msk [vmem:[#allocation2 + $0x10] sm:$0xff] %vm109_vm0, %v2416_v51 }
 0x9dd   :  { %v952_v53 = vld [vmem:[#allocation2 + $0x8] sm:$0xff] }
 0x9de   :  { %v955_v54 = vpack.c.bf16 %v952_v53, %v951_v52  ;;  %v1295_v6 = vrot.slane %v952_v53, 6  ;;  %v1307_v11 = vrot.slane %v952_v53, 2 }
 0x9e0   :  { %v969_v60 = vrot.slane %v955_v54, 3  ;;  %v1029_v62 = vrot.slane %v955_v54, 2  ;;  %v1296_v15 = vsel %vm1293_vm9, %v1294_v5, %v1295_v6 }
 0x9e1   :  { %v953_v56 = vld [vmem:[#allocation2 + $0x10] sm:$0xff]  ;;  %v1301_v21 = vsel %vm1288_vm11, %v1296_v15, -1e+30 }
 0x9e2   :  { %v956_v57 = vpack.c.bf16 %v953_v56, %v953_v56  ;;  %v1308_v58 = vrot.slane %v953_v56, 2  ;;  %v1088_v50 = vpack.c.bf16 %v953_v56, %v952_v53  ;;  %v1297_v9 = vrot.slane %v953_v56, 6 }
 0x9e4   :  { %v970_v61 = vrot.slane %v956_v57, 3  ;;  %v1030_v63 = vrot.slane %v956_v57, 2  ;;  %v1311_v10 = vsel %vm1028_vm8, %v1308_v58, %v1310_v59  ;;  %v1309_v17 = vsel %vm1028_vm8, %v1307_v11, %v1308_v58 }
 0x9e5   :  { %v1161_v18 = vrot.slane %v1088_v50, 1  ;;  %v1298_v19 = vsel %vm1293_vm9, %v1295_v6, %v1297_v9  ;;  %v1315_v20 = vsel %vm1304_vm10, %v1311_v10, -1e+30  ;;  %v1316_v25 = vmax.f32 %v1301_v21, %v1309_v17 }
 0x9e6   :  { %v971_v8 = vsel %vm968_vm7, %v969_v60, %v970_v61  ;;  %v1031_v47 = vsel %vm1028_vm8, %v1029_v62, %v1030_v63  ;;  %v1317_v26 = vmax.f32 %v1298_v19, %v1315_v20  ;;  %v1227_v31 = vrot.slane %v1088_v50, 2 }
 0x9e7   :  { %1857 = vmatmul.mubr.msk.bf16.vlgmr.msra.gmra.mrb[20].mxu1 %vm109_vm0, %v971_v8  ;;  %1865 = vmatmul.mubr.msk.bf16.vlgmr.msra.gmra.mrb[32].mxu0 %vm109_vm0, %v1031_v47  ;;  %v1163_v13 = vsel %vm1160_vm12, %v1161_v18, %v1162_v16  ;;  %v1318_v29 = vmax.f32 %v952_v53, %v1316_v25  ;;  %v1700_v25 = vld [vmem:[%s2553_s11] ss:$0 sm:$0xff] }
 0x9e8   :  { %1869 = vmatpush3.bf16.msra.mxu1 %v1954_v1  ;;  %1877 = vmatpush3.bf16.msra.mxu0 %v1955_v2  ;;  %v1319_v30 = vmax.f32 %v953_v56, %v1317_v26  ;;  %v1229_v33 = vsel %vm1028_vm8, %v1227_v31, %v1228_v3 }
 0x9e9   :  { %1870 = vmatprep.subr.bf16.mxu1 %v2088_v0  ;;  %1878 = vmatprep.subr.bf16.mxu0 %v2088_v0 }
 0x9ea   :  { %1872 = vmatprep.mubr.msk.bf16.mxu1 %vm2089_vm1, %v2088_v0  ;;  %1880 = vmatprep.mubr.msk.bf16.mxu0 %vm2089_vm1, %v2088_v0  ;;  %v1320_v32 = vpack.c.bf16 %v1319_v30, %v1318_v29 }
 0x9ec   :  { %1871 = vmatpush3.bf16.msra.mxu1 %v1956_v12  ;;  %1879 = vmatpush3.bf16.msra.mxu0 %v1957_v14 }
 0x9ed   :  { %1884 = vmatprep.subr.bf16.mxu1 %v2088_v0  ;;  %1892 = vmatprep.subr.bf16.mxu0 %v2088_v0 }
 0x9ef   :  { %1873 = vmatmul.mubr.msk.bf16.vlgmr.msra.gmra.mrb[24].mxu1 %vm109_vm0, %v1088_v50  ;;  %1881 = vmatmul.mubr.msk.bf16.vlgmr.msra.gmra.mrb[36].mxu0 %vm109_vm0, %v1163_v13  ;;  %v1699_v50 = vld [vmem:[%s2551_s9] ss:$0 sm:$0xff] }
 0x9f0   :  { %1885 = vmatpush3.bf16.msra.mxu1 %v1958_v22  ;;  %1893 = vmatpush3.bf16.msra.mxu0 %v1959_v23  ;;  %v1970_v22 = vld [vmem:[#allocation6] sm:$0xff]   ;;  %v1971_v23 = vld [vmem:[#allocation6 + $0x8] sm:$0xff]  }
 0x9f1   :  { %1886 = vmatprep.subr.bf16.mxu1 %v2088_v0  ;;  %1894 = vmatprep.subr.bf16.mxu0 %v2088_v0 }
 0x9f2   :  { %1888 = vmatprep.mubr.msk.bf16.mxu1 %vm2089_vm1, %v2088_v0  ;;  %1896 = vmatprep.mubr.msk.bf16.mxu0 %vm2089_vm1, %v2088_v0 }
 0x9f4   :  { %1887 = vmatpush3.bf16.msra.mxu1 %v1960_v24  ;;  %1895 = vmatpush3.bf16.msra.mxu0 %v1961_v28 }
 0x9f5   :  { %1900 = vmatprep.subr.bf16.mxu1 %v2088_v0  ;;  %1920 = vmatprep.subr.bf16.mxu0 %v2088_v0 }
 0x9f7   :  { %1889 = vmatmul.mubr.msk.bf16.vlgmr.msra.gmra.mrb[28].mxu1 %vm109_vm0, %v1229_v33  ;;  %1897 = vmatmul.mubr.msk.bf16.vlgmr.msra.gmra.mrb[40].mxu0 %vm109_vm0, %v1320_v32 }
 0x9f8   :  { %1901 = vmatpush3.bf16.msra.mxu1 %v1962_v4  ;;  %1916 = vmatprep.mubr.msk.bf16.mxu1 %vm2089_vm1, %v2088_v0 }
 0x9f9   :  { %1902 = vmatprep.subr.bf16.mxu1 %v2088_v0  ;;  %1924 = vmatprep.mubr.msk.bf16.mxu0 %vm2089_vm1, %v2088_v0 }
 0x9fa   :  { %1921 = vmatpush3.bf16.msra.mxu0 %v1970_v22 }
 0x9fb   :  { %1922 = vmatprep.subr.bf16.mxu0 %v2088_v0 }
 0x9fc   :  { %1903 = vmatpush3.bf16.msra.mxu1 %v1963_v35 }
 0x9fd   :  { %1904 = vmatprep.subr.bf16.mxu1 %v2088_v0 }
 0x9fe   :  { %1923 = vmatpush3.bf16.msra.mxu0 %v1971_v23 }
 0xa00   :  { %1905 = vmatpush3.bf16.msra.mxu1 %v1964_v36 }
 0xa01   :  { %1906 = vmatprep.subr.bf16.mxu1 %v2088_v0 }
 0xa04   :  { %1907 = vmatpush3.bf16.msra.mxu1 %v1965_v37 }
 0xa05   :  { %1908 = vmatprep.subr.bf16.mxu1 %v2088_v0 }
 0xa08   :  { %1909 = vmatpush3.bf16.msra.mxu1 %v1966_v38 }
 0xa09   :  { %1910 = vmatprep.subr.bf16.mxu1 %v2088_v0 }
 0xa0c   :  { %1911 = vmatpush3.bf16.msra.mxu1 %v1967_v39 }
 0xa0d   :  { %1912 = vmatprep.subr.bf16.mxu1 %v2088_v0 }
 0xa10   :  { %1913 = vmatpush3.bf16.msra.mxu1 %v1968_v40 }
 0xa11   :  { %1914 = vmatprep.subr.bf16.mxu1 %v2088_v0  ;;  %v1709_v0 = vld [vmem:[%s2555_s13] ss:$0 sm:$0xff] }
 0xa14   :  { %1915 = vmatpush3.bf16.msra.mxu1 %v1969_v41 }
 0xaba   :  { %v1021_v42 = vpop.f32.mrb[20].mxu1  ;;  %v1081_v43 = vpop.f32.mrb[32].mxu0 }
 0xabb   :  { %v1082_v44 = vadd.f32 %v1081_v43, %v1021_v42  ;;  %v1858_v27 = vpop.f32.mrb[21].mxu1  ;;  %v1866_v45 = vpop.f32.mrb[33].mxu0 }
 0xabc   :  { %v1024_v46 = vpop.f32.mrb[22].mxu1  ;;  %v1084_v48 = vpop.f32.mrb[34].mxu0 }
 0xabd   :  { %v1085_v49 = vadd.f32 %v1084_v48, %v1024_v46  ;;  %v1859_v52 = vpop.f32.mrb[23].mxu1  ;;  %v1867_v53 = vpop.f32.mrb[35].mxu0 }
 0xac2   :  { %v1143_v54 = vpop.f32.mrb[24].mxu1  ;;  %v1213_v55 = vpop.f32.mrb[36].mxu0 }
 0xac3   :  { %v1150_v56 = vadd.f32 %v1143_v54, %v1082_v44  ;;  %v1874_v57 = vpop.f32.mrb[25].mxu1  ;;  %v1882_v58 = vpop.f32.mrb[37].mxu0 }
 0xac4   :  { %v1146_v59 = vpop.f32.mrb[26].mxu1  ;;  %v1216_v60 = vpop.f32.mrb[38].mxu0 }
 0xac5   :  { %v1220_v61 = vadd.f32 %v1213_v55, %v1150_v56  ;;  %v1151_v62 = vadd.f32 %v1146_v59, %v1085_v49  ;;  %v1875_v63 = vpop.f32.mrb[27].mxu1  ;;  %v1883_v1 = vpop.f32.mrb[39].mxu0 }
 0xac7   :  { %v1221_v2 = vadd.f32 %v1216_v60, %v1151_v62  ;;  %v1713_v60 = vld [vmem:[%s2556_s14] ss:$0 sm:$0xff] }
 0xac8   :  { %v1714_v62 = vld [vmem:[%s2557_s15] ss:$0 sm:$0xff] }
 0xaca   :  { %v1279_v5 = vpop.f32.mrb[28].mxu1  ;;  %v1374_v6 = vpop.f32.mrb[40].mxu0 }
 0xacb   :  { %v1286_v7 = vadd.f32 %v1279_v5, %v1220_v61  ;;  %v1890_v8 = vpop.f32.mrb[29].mxu1  ;;  %v1898_v47 = vpop.f32.mrb[41].mxu0 }
 0xacc   :  { %v1282_v9 = vpop.f32.mrb[30].mxu1  ;;  %v1377_v10 = vpop.f32.mrb[42].mxu0 }
 0xacd   :  { %v1381_v11 = vadd.f32 %v1374_v6, %v1286_v7  ;;  %v1287_v12 = vadd.f32 %v1282_v9, %v1221_v2  ;;  %v1891_v14 = vpop.f32.mrb[31].mxu1  ;;  %v1899_v15 = vpop.f32.mrb[43].mxu0 }
 0xacf   :  { %v1390_v16 = vadd.f32 %v1699_v50, %v1381_v11  ;;  %v1382_v17 = vadd.f32 %v1377_v10, %v1287_v12 }
 0xad1   :  { %v1391_v18 = vadd.f32 %v1699_v50, %v1382_v17  ;;  %v1392_v19 = vmax.f32 %v1390_v16, 0.0 }
 0xad3   :  { %v1393_v20 = vmax.f32 %v1391_v18, 0.0 }
 0xad5   :  { %v1394_v21 = vpack.c.bf16 %v1393_v20, %v1392_v19 }
 0xad7   :  { %1917 = vmatmul.mubr.bf16.vlgmr.msra.gmra.mrb[32].mxu1 %v1394_v21 }
 0xbaa   :  { %v1500_v26 = vpop.f32.mrb[32].mxu1 }
 0xbab   :  { %v1501_v13 = vadd.f32 %v1700_v25, %v1500_v26  ;;  %v1918_v24 = vpop.f32.mrb[33].mxu1 }
 0xbac   :  { %v1503_v28 = vpop.f32.mrb[34].mxu1 }
 0xbad   :  { %v1504_v29 = vadd.f32 %v1700_v25, %v1503_v28  ;;  %v1919_v30 = vpop.f32.mrb[35].mxu1  ;;  %v1507_v31 = vmax.f32 %v1501_v13, 0.0 }
 0xbaf   :  { %v1508_v3 = vmax.f32 %v1504_v29, 0.0 }
 0xbb1   :  { %v1509_v4 = vpack.c.bf16 %v1508_v3, %v1507_v31 }
 0xbb3   :  { %1925 = vmatmul.mubr.msk.bf16.vlgmr.msra.gmra.mrb[44].mxu0 %vm109_vm0, %v1509_v4 }
 0xc86   :  { %v1570_v32 = vpop.f32.mrb[44].mxu0 }
 0xc87   :  { %v1571_v33 = vadd.f32 %v1709_v0, %v1570_v32  ;;  %v1926_v35 = vpop.f32.mrb[45].mxu0 }
 0xc88   :  { %v1573_v36 = vpop.f32.mrb[46].mxu0 }
 0xc89   :  { %v1574_v37 = vadd.f32 %v1709_v0, %v1573_v36  ;;  %v1927_v38 = vpop.f32.mrb[47].mxu0  ;;  %v1577_v39 = vadd.f32 %v1571_v33, %v2412_v34 }
 0xc8b   :  { %v1579_v40 = vsel %vm109_vm0, %v1577_v39, 0.0  ;;  %v1578_v41 = vadd.f32 %v1574_v37, %v2416_v51 }
 0xc8c   :  { %1580 = vadd.xlane.f32.xlu0 %v1579_v40 }
 0xc8d   :  { %v1582_v42 = vsel %vm109_vm0, %v1578_v41, 0.0 }
 0xc90   :  { %1583 = vadd.xlane.f32.xlu0 %v1582_v42 }
 0xd19   :  { %v1581_v43 = vpop.xlane.xlu0 %1580 }
 0xd1a   :  { %v1585_v44 = vmul.f32 0.03125, %v1581_v43 }
 0xd1c   :  { %v1587_v27 = vsub.f32 %v1577_v39, %v1585_v44 }
 0xd1d   :  { %v1584_v45 = vpop.xlane.xlu0 %1583 }
 0xd1e   :  { %v1586_v46 = vmul.f32 0.03125, %v1584_v45  ;;  %v1589_v48 = vmul.f32 %v1587_v27, %v1587_v27 }
 0xd20   :  { %v1588_v49 = vsub.f32 %v1578_v41, %v1586_v46  ;;  %v1591_v52 = vsel %vm109_vm0, %v1589_v48, 0.0 }
 0xd21   :  { %1592 = vadd.xlane.f32.xlu0 %v1591_v52 }
 0xd22   :  { %v1590_v53 = vmul.f32 %v1588_v49, %v1588_v49 }
 0xd24   :  { %v1594_v34 = vsel %vm109_vm0, %v1590_v53, 0.0 }
 0xd25   :  { %1595 = vadd.xlane.f32.xlu0 %v1594_v34 }
 0xdae   :  { %v1593_v54 = vpop.xlane.xlu0 %1592 }
 0xdaf   :  { %v1597_v51 = vmul.f32 0.03125, %v1593_v54 }
 0xdb1   :  { %v1599_v55 = vadd.f32 1e-05, %v1597_v51 }
 0xdb2   :  { %v1596_v56 = vpop.xlane.xlu0 %1595 }
 0xdb3   :  { %2008 = vrsqrt.f32 %v1599_v55  ;;  %v1598_v57 = vmul.f32 0.03125, %v1596_v56 }
 0xdb5   :  { %v1600_v58 = vadd.f32 1e-05, %v1598_v57 }
 0xdb7   :  { %2010 = vrsqrt.f32 %v1600_v58 }
 0xdbd   :  { %v2009_v59 = vpop.eup %2008 }
 0xdbe   :  { %v1603_v61 = vmul.f32 %v2009_v59, %v1587_v27 }
 0xdc0   :  { %v1612_v63 = vmul.f32 %v1713_v60, %v1603_v61 }
 0xdc1   :  { %v2011_v1 = vpop.eup %2010 }
 0xdc2   :  { %v1604_v2 = vmul.f32 %v2011_v1, %v1588_v49  ;;  %v1621_v5 = vadd.f32 %v1714_v62, %v1612_v63 }
 0xdc4   :  { %v1613_v6 = vmul.f32 %v1713_v60, %v1604_v2  ;;  %1623 = vst.msk [vmem:[#allocation8] sm:$0xff] %vm109_vm0, %v1621_v5 }
 0xdc6   :  { %v1622_v7 = vadd.f32 %v1714_v62, %v1613_v6 }
 0xdc8   :  { %1624 = vst.msk [vmem:[#allocation8 + $0x8] sm:$0xff] %vm109_vm0, %v1622_v7 }
 0xdc9   :  { %2067 = shalt.err (!%p2064_p6)
}
 0xdca   :  { %s2068_s28 = scalar_lea.hbm %s2558_s16, 256 }
 0xdcb   :  { %p2069_p7 = scmp.ne.s32.totalorder %s2558_s16, %s2068_s28  ;;  %p2072_p8 = scmp.lt.u32.totalorder %s2068_s28, %s2558_s16 }
 0xdcd   :  { %p2074_p9 = pnand %p2072_p8, %p2069_p7 }
 0xdcf   :  { %2077 = shalt.err (!%p2074_p9)
}
 0xdd0   :  { %s2102_s30 = smov 128   ;;  %s2103_s8 = smov 8  }
 0xdd1   :  { %1636 = dma.vmem_to_hbm [thread:$0]  %s1631_s4, 256, %s2558_s16, [#allocation5], %s2102_s30, %s2102_s30, %s2103_s8  }
 0xdd2   :  { %2082 = dma.done.wait [#allocation5], 256  }
 0xdd3   :  { %2083 = vsyncadd [#allocation5], 4294967040 }
 0xdd4   :  { %1640 = vsyncpa [#allocation4], 1 }
 0xdd5   :  { %1641 = vsyncpa [#allocation7], 1 }
 0xdd6   :  { %1642 = vsyncpa [#allocation5], 1 }

</bundles_post_ra>
